<compile_context>
chip_gen: v5e
topology: v5e:2x2
jax: 0.10.0
libtpu: 0.0.40
codegen_flags: <defaults>
</compile_context>

<pallas_src>
import functools
import math

import numpy as np
import jax
import jax.numpy as jnp
from jax.experimental import pallas as pl
from jax.experimental.pallas import tpu as pltpu

_VMEM_LIMIT = 64 * 1024 * 1024   # <= physical VMEM on v5e/v6e (128 MiB) and v7x (64 MiB)


def _round_up(x, m):
    return ((x + m - 1) // m) * m


# ----------------------------------------------------------------------------
# Reference helpers (ported verbatim semantics, host-side glue)
# ----------------------------------------------------------------------------
def extend_conv_spec(convolutions):
    extended = []
    for spec in convolutions:
        if len(spec) == 3:
            extended.append(spec)
        elif len(spec) == 2:
            extended.append(spec + (1,))
        else:
            raise Exception("invalid conv spec " + str(spec))
    return tuple(extended)


def find_subsequence_indices_np(src, src_with_prev):
    # TODO(synk): data-dependent token matching loop -> host NumPy, no Pallas equivalent.
    src = np.asarray(src)
    swp = np.asarray(src_with_prev)
    assert src.shape[0] == swp.shape[0]
    musk = np.zeros_like(swp, dtype=np.int32)
    for i in range(swp.shape[0]):
        musk[i, 0] = 1
        L = swp.shape[1]
        filtered = src[i, 1:]
        lf = filtered.shape[0]
        for k in range(L - lf + 1):
            if np.array_equal(swp[i, k:k + lf], filtered):
                musk[i, k - 1:k + lf] = 1   # mirrors reference (incl. k==0 corner case)
                break
    return musk


def apply_subsequence_select(embed, tokens, mask_np):
    """embed.view(-1,E)[mask].view(B,-1,E) with uniform per-row counts (static shape)."""
    counts = mask_np.sum(axis=1)
    assert (counts == counts[0]).all(), "non-uniform subsequence mask -> dynamic shape"
    idx = np.stack([np.nonzero(mask_np[i])[0] for i in range(mask_np.shape[0])]).astype(np.int32)
    idx_j = jnp.asarray(idx)
    sel_embed = jnp.take_along_axis(embed, idx_j[:, :, None], axis=1)
    sel_tokens = jnp.take_along_axis(tokens, idx_j, axis=1)
    return sel_embed, sel_tokens


# ----------------------------------------------------------------------------
# Pallas kernels
# ----------------------------------------------------------------------------
def _encoder_node_kernel(n_conv, T, conv_shapes, *refs):
    """EncoderNode hot path for one batch chunk (Bb*T rows folded into matmul M):
       LayerNorm -> fc1 -> [mask, conv1d('same'), GLU] x n_conv -> fc2 -> mask,
       y = (x + input_embedding) * sqrt(0.5).
       Matmul weights are streamed from HBM, one stage ahead, double-buffered."""
    x_ref, pad_ref, ln_g, ln_b, fc1_b, fc2_b = refs[:6]
    conv_b = refs[6:6 + n_conv]
    w_hbm = refs[6 + n_conv:8 + 2 * n_conv]          # fc1_w, conv_w..., fc2_w (HBM)
    x_out, y_out, w_scr, w_sem = refs[-4], refs[-3], refs[-2], refs[-1]

    BT, E = x_ref.shape
    n_stage = n_conv + 2

    # ---- manual weight stream: double-buffered per-stage HBM -> VMEM DMA ----
    pending = {}

    def fetch(stage, slot):
        src = w_hbm[stage]
        r, c = src.shape
        cp = pltpu.make_async_copy(src, w_scr.at[slot, pl.ds(0, r), pl.ds(0, c)],
                                   w_sem.at[slot])
        cp.start()
        pending[stage] = (cp, slot, r, c)

    def consume(stage):
        cp, slot, r, c = pending.pop(stage)
        cp.wait()
        return w_scr[slot, 0:r, 0:c]                  # (r, c) bf16

    fetch(0, 0)                                       # fc1 weight

    x = x_ref[...]                                    # (BT, E) f32
    keep = 1.0 - pad_ref[...]                         # (BT, 1): 0.0 where token == 0

    # LayerNorm (eps = 1e-5, affine) in f32 — overlaps the fc1 weight DMA
    mu = jnp.mean(x, axis=-1, keepdims=True)
    var = jnp.mean((x - mu) ** 2, axis=-1, keepdims=True)
    xn = (x - mu) * jax.lax.rsqrt(var + 1e-5) * ln_g[...] + ln_b[...]
    input_embedding = xn                              # post-LN embedding (matches reference)

    w_fc1 = consume(0)
    if n_stage > 1:
        fetch(1, 1)
    h = jnp.dot(xn.astype(jnp.bfloat16), w_fc1,
                preferred_element_type=jnp.float32) + fc1_b[...]

    # row index within each batch element (for conv edge masking)
    rt = jax.lax.broadcasted_iota(jnp.int32, (BT, 1), 0) % T

    # conv + GLU stack: im2col via pltpu.roll shifts (XLU), one fused MXU dot per layer
    for li in range(n_conv):
        stage = li + 1
        K, Cin, Co2 = conv_shapes[li]
        Co = Co2 // 2
        PL = (K - 1) // 2                             # 'same' left pad (odd & even K)

        w = consume(stage)                            # (K*Cin, Co2) bf16
        if stage + 1 < n_stage:
            fetch(stage + 1, (stage + 1) & 1)

        hm = h * keep                                 # masked_fill(pad, 0), f32
        pieces = []
        for k in range(K):                            # static unroll over taps
            off = k - PL                              # tap reads input row r + off
            sh = hm if off == 0 else pltpu.roll(hm, shift=(-off) % BT, axis=0)
            valid = jnp.logical_and(rt + off >= 0, rt + off < T)
            pieces.append(jnp.where(valid, sh, 0.0).astype(jnp.bfloat16))
        xs = jnp.concatenate(pieces, axis=1)          # (BT, K*Cin) bf16, lane-aligned
        acc = jnp.dot(xs, w, preferred_element_type=jnp.float32) + conv_b[li][...]
        # TODO(synk): for prod Co=192 (non-128-multiple) split into separate
        # value/gate dots to keep the GLU split lane-aligned.
        h = acc[:, :Co] * jax.nn.sigmoid(acc[:, Co:])  # GLU over channels

    # fc2 + pad mask + residual
    w_fc2 = consume(n_stage - 1)
    x2 = jnp.dot(h.astype(jnp.bfloat16), w_fc2,
                 preferred_element_type=jnp.float32) + fc2_b[...]
    x2 = x2 * keep
    x_out[...] = x2
    y_out[...] = (x2 + input_embedding) * math.sqrt(0.5)


def _decoder_logits_kernel(x_ref, ln_g, ln_b, fc1_w, fc1_b,
                           fcg_wx, fcg_we, fcg_b, fc2_w, fc2_b,
                           logits_out, pgen_out, norm_out,
                           h_sc, m_sc, l_sc):
    """Decoder hot path (conv loop is empty in the reference), row-block x vocab grid:
       at v==0: LayerNorm -> fc1 -> p_gen = sigmoid(fcg([x, temb])), h cached in VMEM
       every v: logits tile = h @ fc2_w[:, v-tile]; online max / logsumexp
       at last v: emit logsumexp column.  Padded vocab columns carry a -1e30 bias."""
    v = pl.program_id(1)

    @pl.when(v == 0)
    def _init():
        x = x_ref[...]                                # (tr, E) f32
        mu = jnp.mean(x, axis=-1, keepdims=True)
        var = jnp.mean((x - mu) ** 2, axis=-1, keepdims=True)
        xn = (x - mu) * jax.lax.rsqrt(var + 1e-5) * ln_g[...] + ln_b[...]
        h = jnp.dot(xn.astype(jnp.bfloat16), fc1_w[...],
                    preferred_element_type=jnp.float32) + fc1_b[...]
        # fcg on concat([x_conv, target_embedding]) as a split matvec (no lane concat)
        gate = (jnp.sum(h * fcg_wx[...], axis=-1, keepdims=True)
                + jnp.sum(xn * fcg_we[...], axis=-1, keepdims=True)
                + fcg_b[...])
        pgen_out[...] = jax.nn.sigmoid(gate)
        h_sc[...] = h.astype(jnp.bfloat16)
        m_sc[...] = jnp.full(m_sc.shape, -jnp.inf, jnp.float32)
        l_sc[...] = jnp.zeros(l_sc.shape, jnp.float32)

    # streaming fc2 over the vocab tile
    logits = jnp.dot(h_sc[...], fc2_w[...],
                     preferred_element_type=jnp.float32) + fc2_b[...]
    logits_out[...] = logits
    # TODO(synk): at large BT store logits in bf16 (or recompute in the finalize
    # pass) to cut the (BT,V) f32 HBM round-trip on v5e.

    # online softmax statistics (f32)
    m_old = m_sc[...]
    m_new = jnp.maximum(m_old, jnp.max(logits, axis=-1, keepdims=True))
    l_sc[...] = (l_sc[...] * jnp.exp(m_old - m_new)
                 + jnp.sum(jnp.exp(logits - m_new), axis=-1, keepdims=True))
    m_sc[...] = m_new

    @pl.when(v == pl.num_programs(1) - 1)
    def _fin():
        norm_out[...] = m_sc[...] + jnp.log(l_sc[...])   # per-row logsumexp


def _decoder_finalize_kernel(logits_ref, norm_ref, pgen_ref, out_ref):
    """out = log(softmax(logits) * p_gen + 1e-32), computed per vocab tile as
       log(exp(logit - logsumexp) * p_gen + 1e-32) — exact semantics, no (T,V) divide."""
    z = jnp.exp(logits_ref[...] - norm_ref[...]) * pgen_ref[...]
    out_ref[...] = jnp.log(z + 1e-32)


# ----------------------------------------------------------------------------
# pallas_call wrappers
# ----------------------------------------------------------------------------
def _const_spec(arr, grid_ndim):
    nd = arr.ndim
    if grid_ndim == 1:
        return pl.BlockSpec(arr.shape, lambda i, _n=nd: (0,) * _n)
    if grid_ndim == 2:
        return pl.BlockSpec(arr.shape, lambda i, j, _n=nd: (0,) * _n)
    raise ValueError("unsupported grid rank")


def _pick_bb(B, T, target_rows=512, min_grid_steps=2):
    """Largest divisor of B s.t. bb*T ~ target matmul rows, but keep >=2 grid steps
       (v7x megacore) when B allows it."""
    cap = max(1, target_rows // max(T, 1))
    if B >= min_grid_steps:
        cap = min(cap, B // min_grid_steps)
    bb = min(B, max(1, cap))
    while B % bb:
        bb -= 1
    if (bb * T) % 8 != 0:           # keep the row block sublane-aligned, or full
        bb = B
    return bb


def _pick_row_tile(BT, target_rows=256):
    """Largest 8-multiple divisor of BT <= target that still yields >=2 row blocks."""
    if BT % 8 != 0:
        return BT
    cands = [tr for tr in range(8, BT + 1, 8)
             if BT % tr == 0 and tr <= target_rows and BT // tr >= 2]
    return max(cands) if cands else BT


def run_encoder_node(embed, pad_mask, p):
    B, T, E = embed.shape
    n_conv = len(p["conv_w"])
    conv_shapes = tuple(p["conv_shapes"])
    bb = _pick_bb(B, T)
    grid = (B // bb,)
    BTb = bb * T

    # weight-stream scratch sizing (2 slots, max over all stages, layout-padded)
    w_rows = [p["fc1_w"].shape[0]] + [w.shape[0] for w in p["conv_w"]] + [p["fc2_w"].shape[0]]
    w_cols = [p["fc1_w"].shape[1]] + [w.shape[1] for w in p["conv_w"]] + [p["fc2_w"].shape[1]]
    r_max = _round_up(max(w_rows), 16)
    c_max = _round_up(max(w_cols), 128)

    x2 = embed.reshape(B * T, E)
    pad2 = pad_mask.reshape(B * T, 1)

    cs = lambda a: _const_spec(a, 1)
    any_spec = pl.BlockSpec(memory_space=pl.ANY)      # raw HBM ref, manual DMA

    inputs = ([x2, pad2, p["ln_g"], p["ln_b"], p["fc1_b"], p["fc2_b"]]
              + list(p["conv_b"])
              + [p["fc1_w"]] + list(p["conv_w"]) + [p["fc2_w"]])
    in_specs = ([pl.BlockSpec((BTb, E), lambda b: (b, 0)),
                 pl.BlockSpec((BTb, 1), lambda b: (b, 0)),
                 cs(p["ln_g"]), cs(p["ln_b"]), cs(p["fc1_b"]), cs(p["fc2_b"])]
                + [cs(b_) for b_ in p["conv_b"]]
                + [any_spec] * (n_conv + 2))

    out_shape = (jax.ShapeDtypeStruct((B * T, E), jnp.float32),
                 jax.ShapeDtypeStruct((B * T, E), jnp.float32))
    out_specs = (pl.BlockSpec((BTb, E), lambda b: (b, 0)),
                 pl.BlockSpec((BTb, E), lambda b: (b, 0)))

    x_out, y_out = pl.pallas_call(
        functools.partial(_encoder_node_kernel, n_conv, T, conv_shapes),
        grid=grid,
        in_specs=in_specs,
        out_specs=out_specs,
        out_shape=out_shape,
        scratch_shapes=[pltpu.VMEM((2, r_max, c_max), jnp.bfloat16),
                        pltpu.SemaphoreType.DMA((2,))],
        compiler_params=pltpu.CompilerParams(
            dimension_semantics=("parallel",),
            vmem_limit_bytes=_VMEM_LIMIT),
    )(*inputs)
    return x_out.reshape(B, T, E), y_out.reshape(B, T, E)


def run_decoder(embed, p, *, tv=512):
    B, T, E = embed.shape
    C = p["fc1_w"].shape[1]
    V = p["fc2_w"].shape[1]
    BT = B * T
    x2d = embed.reshape(BT, E)

    # vocab tiling: pad V up to a tv multiple; padded columns get a -1e30 bias so
    # they drop out of the online logsumexp (never make the (C,V) weight resident).
    tv = min(tv, _round_up(V, 128))
    Vp = _round_up(V, tv)
    nv = Vp // tv
    fc2_w, fc2_b = p["fc2_w"], p["fc2_b"]
    if Vp != V:
        fc2_w = jnp.pad(fc2_w, ((0, 0), (0, Vp - V)))
        fc2_b = jnp.pad(fc2_b, ((0, 0), (0, Vp - V)), constant_values=-1e30)

    tr = _pick_row_tile(BT)     # row-block axis -> "parallel" (v7x second TensorCore)
    nr = BT // tr

    cs = lambda a: _const_spec(a, 2)
    inputs = [x2d, p["ln_g"], p["ln_b"], p["fc1_w"], p["fc1_b"],
              p["fcg_wx"], p["fcg_we"], p["fcg_b"], fc2_w, fc2_b]
    in_specs = [pl.BlockSpec((tr, E), lambda r, v: (r, 0)),
                cs(p["ln_g"]), cs(p["ln_b"]), cs(p["fc1_w"]), cs(p["fc1_b"]),
                cs(p["fcg_wx"]), cs(p["fcg_we"]), cs(p["fcg_b"]),
                pl.BlockSpec((C, tv), lambda r, v: (0, v)),      # streamed weight tile
                pl.BlockSpec((1, tv), lambda r, v: (0, v))]
    # TODO(synk): stream fc2_w as int8 (v5e/v6e) / fp8 (v7x) with per-column scales
    # when the vocab sweep is weight-bandwidth-bound.

    logits, p_gen, norm = pl.pallas_call(
        _decoder_logits_kernel,
        grid=(nr, nv),
        in_specs=in_specs,
        out_specs=(pl.BlockSpec((tr, tv), lambda r, v: (r, v)),
                   pl.BlockSpec((tr, 1), lambda r, v: (r, 0)),
                   pl.BlockSpec((tr, 1), lambda r, v: (r, 0))),
        out_shape=(jax.ShapeDtypeStruct((BT, Vp), jnp.float32),
                   jax.ShapeDtypeStruct((BT, 1), jnp.float32),
                   jax.ShapeDtypeStruct((BT, 1), jnp.float32)),
        scratch_shapes=[pltpu.VMEM((tr, C), jnp.bfloat16),
                        pltpu.VMEM((tr, 1), jnp.float32),
                        pltpu.VMEM((tr, 1), jnp.float32)],
        compiler_params=pltpu.CompilerParams(
            dimension_semantics=("parallel", "arbitrary"),
            vmem_limit_bytes=_VMEM_LIMIT),
    )(*inputs)

    log_probs = pl.pallas_call(
        _decoder_finalize_kernel,
        grid=(nv,),
        in_specs=[pl.BlockSpec((BT, tv), lambda v: (0, v)),
                  pl.BlockSpec((BT, 1), lambda v: (0, 0)),
                  pl.BlockSpec((BT, 1), lambda v: (0, 0))],
        out_specs=pl.BlockSpec((BT, tv), lambda v: (0, v)),
        out_shape=jax.ShapeDtypeStruct((BT, Vp), jnp.float32),
        compiler_params=pltpu.CompilerParams(
            dimension_semantics=("parallel",),
            vmem_limit_bytes=_VMEM_LIMIT),
    )(logits, norm, p_gen)

    return log_probs[:, :V].reshape(B, T, V)


# ----------------------------------------------------------------------------
# Parameter init (deterministic, mirrors the PyTorch __init__ shapes / stds)
# Matmul weights are stored in bf16 (MXU operands); biases / LN params in f32.
# ----------------------------------------------------------------------------
def init_encoder_node(key, embed_dim, convolutions, dropout=0.1):
    convolutions = extend_conv_spec(convolutions)
    in_channels = convolutions[0][0]
    ks = iter(jax.random.split(key, 4 + len(convolutions)))
    p = {
        "ln_g": jnp.ones((1, embed_dim), jnp.float32),
        "ln_b": jnp.zeros((1, embed_dim), jnp.float32),
        "fc1_w": (math.sqrt((1 - dropout) / embed_dim)
                  * jax.random.normal(next(ks), (embed_dim, in_channels), jnp.float32)
                  ).astype(jnp.bfloat16),
        "fc1_b": jnp.zeros((1, in_channels), jnp.float32),
        "conv_w": [], "conv_b": [], "conv_shapes": [],
    }
    ic = in_channels
    for (oc, ksz, _res) in convolutions:
        std = math.sqrt(4 * (1.0 - dropout) / (ksz * ic))
        w = std * jax.random.normal(next(ks), (ksz, ic, 2 * oc), jnp.float32)
        # im2col layout: (K*Cin, 2*Co), channel order [value | gate]
        p["conv_w"].append(w.reshape(ksz * ic, 2 * oc).astype(jnp.bfloat16))
        p["conv_b"].append(jnp.zeros((1, 2 * oc), jnp.float32))
        p["conv_shapes"].append((ksz, ic, 2 * oc))
        ic = oc
    p["fc2_w"] = (math.sqrt((1 - dropout) / ic)
                  * jax.random.normal(next(ks), (ic, embed_dim), jnp.float32)
                  ).astype(jnp.bfloat16)
    p["fc2_b"] = jnp.zeros((1, embed_dim), jnp.float32)
    return p


def init_decoder(key, embed_dim, convolutions, vocab, dropout=0.1):
    convolutions = extend_conv_spec(convolutions)
    in_channels = convolutions[0][0]
    out_channels = convolutions[-1][0]
    k1, k2, k3, k4 = jax.random.split(key, 4)
    std_g = math.sqrt((1 - dropout) / (embed_dim + out_channels))
    # NOTE: decoder ConvTBC weights exist in the PyTorch module but are never used
    # in forward (self.attentions is empty -> zip() loop is empty); not allocated.
    return {
        "ln_g": jnp.ones((1, embed_dim), jnp.float32),
        "ln_b": jnp.zeros((1, embed_dim), jnp.float32),
        "fc1_w": (math.sqrt((1 - dropout) / embed_dim)
                  * jax.random.normal(k1, (embed_dim, in_channels), jnp.float32)
                  ).astype(jnp.bfloat16),
        "fc1_b": jnp.zeros((1, in_channels), jnp.float32),
        # fcg = Linear(embed_dim + out_channels, 1) split into the [x | temb] halves.
        "fcg_wx": std_g * jax.random.normal(k2, (1, out_channels), jnp.float32),
        "fcg_we": std_g * jax.random.normal(k3, (1, embed_dim), jnp.float32),
        "fcg_b": jnp.zeros((1, 1), jnp.float32),
        "fc2_w": (math.sqrt((1 - dropout) / out_channels)
                  * jax.random.normal(k4, (out_channels, vocab), jnp.float32)
                  ).astype(jnp.bfloat16),
        "fc2_b": jnp.zeros((1, vocab), jnp.float32),
    }


# ----------------------------------------------------------------------------
# Pure-JAX references (same bf16 weights) for in-script correctness checks
# ----------------------------------------------------------------------------
def _encoder_node_ref(embed, pad_mask, p):
    f32 = jnp.float32
    B, T, E = embed.shape
    keep = 1.0 - pad_mask
    mu = embed.mean(-1, keepdims=True)
    var = ((embed - mu) ** 2).mean(-1, keepdims=True)
    xn = (embed - mu) * jax.lax.rsqrt(var + 1e-5) * p["ln_g"][0] + p["ln_b"][0]
    h = (xn.astype(jnp.bfloat16).astype(f32) @ p["fc1_w"].astype(f32)) + p["fc1_b"][0]
    for li, (K, Cin, Co2) in enumerate(p["conv_shapes"]):
        Co = Co2 // 2
        PL = (K - 1) // 2
        hm = (h * keep).astype(jnp.bfloat16).astype(f32)
        hp = jnp.pad(hm, ((0, 0), (PL, K - 1 - PL), (0, 0)))
        w = p["conv_w"][li].astype(f32).reshape(K, Cin, Co2)
        acc = p["conv_b"][li][0] + jnp.zeros((B, T, Co2), f32)
        for k in range(K):
            acc = acc + jnp.einsum("btc,cd->btd", hp[:, k:k + T, :], w[k])
        h = acc[..., :Co] * jax.nn.sigmoid(acc[..., Co:])
    x2 = (h.astype(jnp.bfloat16).astype(f32) @ p["fc2_w"].astype(f32)) + p["fc2_b"][0]
    x2 = x2 * keep
    return x2, (x2 + xn) * math.sqrt(0.5)


def _decoder_ref(embed, p):
    f32 = jnp.float32
    mu = embed.mean(-1, keepdims=True)
    var = ((embed - mu) ** 2).mean(-1, keepdims=True)
    xn = (embed - mu) * jax.lax.rsqrt(var + 1e-5) * p["ln_g"][0] + p["ln_b"][0]
    h = (xn.astype(jnp.bfloat16).astype(f32) @ p["fc1_w"].astype(f32)) + p["fc1_b"][0]
    gate = ((h * p["fcg_wx"][0]).sum(-1, keepdims=True)
            + (xn * p["fcg_we"][0]).sum(-1, keepdims=True) + p["fcg_b"][0, 0])
    p_gen = jax.nn.sigmoid(gate)
    logits = (h.astype(jnp.bfloat16).astype(f32) @ p["fc2_w"].astype(f32)) + p["fc2_b"][0]
    probs = jax.nn.softmax(logits, axis=-1)
    return jnp.log(probs * p_gen + 1e-32)


# ----------------------------------------------------------------------------
# CGModel forward (orchestration = plain JAX glue around the Pallas kernels)
# ----------------------------------------------------------------------------
def cg_model_forward(params, src_ids, src_with_prev_ids, ctx_ids,
                     tgt_ids, tgt_with_prev_ids):
    emb_table = params["emb_table"]          # (V, E), share_embed_model stub

    # ----- Encoder: src EncoderNode (with src_with_prev path) -----
    embed_swp = emb_table[src_with_prev_ids]                         # stub encoder_last_hidden_state
    src_mask_np = find_subsequence_indices_np(src_ids, src_with_prev_ids)
    x_sel, src_tokens = apply_subsequence_select(embed_swp, src_with_prev_ids, src_mask_np)
    src_pad = (src_tokens == 0).astype(jnp.float32)[..., None]       # (B, T, 1)
    src_x, src_y = run_encoder_node(x_sel, src_pad, params["src_enc"])

    # ----- Encoder: context EncoderNode (direct path) -----
    embed_ctx = emb_table[ctx_ids]
    ctx_pad = (ctx_ids == 0).astype(jnp.float32)[..., None]
    ctx_x, ctx_y = run_encoder_node(embed_ctx, ctx_pad, params["ctx_enc"])

    encoder_out = (jnp.concatenate([src_x, ctx_x], axis=1),
                   jnp.concatenate([src_y, ctx_y], axis=1))
    encoder_tokens = jnp.concatenate([src_tokens, ctx_ids], axis=1)
    encoder_padding_mask = jnp.concatenate([src_pad[..., 0] > 0, ctx_pad[..., 0] > 0], axis=1)

    # Decoder's _split_encoder_out (encoder_a transpose) — computed but unused
    # downstream, because the decoder has no attention layers (matches reference).
    encoder_a = jnp.swapaxes(encoder_out[0], 1, 2)
    del encoder_a, encoder_tokens, encoder_padding_mask

    # ----- Decoder -----
    embed_twp = emb_table[tgt_with_prev_ids]
    # TODO(synk): share_embed_model.lm_head is external; stubbed as tied-embedding head.
    lm_logits = jax.nn.log_softmax(embed_twp @ emb_table.T, axis=-1)

    tgt_mask_np = find_subsequence_indices_np(tgt_ids, tgt_with_prev_ids)
    x_tsel, _ = apply_subsequence_select(embed_twp, tgt_with_prev_ids, tgt_mask_np)
    log_probs = run_decoder(x_tsel, params["dec"])

    return log_probs, lm_logits


# ----------------------------------------------------------------------------
# Demo
# ----------------------------------------------------------------------------
if __name__ == "__main__":
    key = jax.random.PRNGKey(0)
    V, E, B = 1000, 128, 2               # vocab (exercises vocab padding), embed_dim, batch
    T_src, T_ctx, T_tgt = 8, 8, 8
    src_convs = ((128, 3),) * 2          # scaled-down ((192,5),)*5
    ctx_convs = ((128, 3),) * 2          # scaled-down ((768,5),)*7
    dec_convs = ((128, 3),) * 2

    k_tab, k_src_enc, k_ctx_enc, k_dec, k_a, k_b, k_c = jax.random.split(key, 7)
    params = {
        "emb_table": 0.02 * jax.random.normal(k_tab, (V, E), jnp.float32),
        "src_enc": init_encoder_node(k_src_enc, E, src_convs),
        "ctx_enc": init_encoder_node(k_ctx_enc, E, ctx_convs),
        "dec": init_decoder(k_dec, E, dec_convs, V),
    }

    src_ids = jax.random.randint(k_a, (B, T_src), 1, V, dtype=jnp.int32)
    src_ids = src_ids.at[1, -2:].set(0)              # exercise the padding mask
    src_with_prev_ids = src_ids                      # identical -> subsequence mask is all-ones
    ctx_ids = jax.random.randint(k_b, (B, T_ctx), 1, V, dtype=jnp.int32)
    tgt_ids = jax.random.randint(k_c, (B, T_tgt), 1, V, dtype=jnp.int32)
    tgt_with_prev_ids = tgt_ids

    log_probs, lm_logits = cg_model_forward(
        params, src_ids, src_with_prev_ids, ctx_ids, tgt_ids, tgt_with_prev_ids)
    jax.block_until_ready((log_probs, lm_logits))

    assert log_probs.shape == (B, T_tgt, V)
    assert lm_logits.shape == (B, T_tgt, V)
    assert bool(jnp.all(jnp.isfinite(log_probs)))

    # ---- correctness spot-checks vs pure-JAX references (same bf16 weights) ----
    embed_swp = params["emb_table"][src_with_prev_ids]
    src_mask_np = find_subsequence_indices_np(src_ids, src_with_prev_ids)
    x_sel, src_tokens = apply_subsequence_select(embed_swp, src_with_prev_ids, src_mask_np)
    src_pad = (src_tokens == 0).astype(jnp.float32)[..., None]
    kx, ky = run_encoder_node(x_sel, src_pad, params["src_enc"])
    rx, ry = _encoder_node_ref(x_sel, src_pad, params["src_enc"])
    assert bool(jnp.allclose(kx, rx, atol=1e-2, rtol=1e-2))
    assert bool(jnp.allclose(ky, ry, atol=1e-2, rtol=1e-2))

    embed_twp = params["emb_table"][tgt_with_prev_ids]
    tgt_mask_np = find_subsequence_indices_np(tgt_ids, tgt_with_prev_ids)
    x_tsel, _ = apply_subsequence_select(embed_twp, tgt_with_prev_ids, tgt_mask_np)
    ref_logp = _decoder_ref(x_tsel, params["dec"])
    assert bool(jnp.allclose(log_probs, ref_logp, atol=1e-2, rtol=1e-2))

    print("KERNEL_OK")
</pallas_src>

<mosaic_0001>
module attributes {stable_mosaic.version = 11 : i64} {
  func.func @_encoder_node_kernel(%arg0: i32, %arg1: memref<8x128xf32, #tpu.memory_space<vmem>>, %arg2: memref<8x1xf32, #tpu.memory_space<vmem>>, %arg3: memref<1x128xf32, #tpu.memory_space<vmem>>, %arg4: memref<1x128xf32, #tpu.memory_space<vmem>>, %arg5: memref<1x128xf32, #tpu.memory_space<vmem>>, %arg6: memref<1x128xf32, #tpu.memory_space<vmem>>, %arg7: memref<1x256xf32, #tpu.memory_space<vmem>>, %arg8: memref<1x256xf32, #tpu.memory_space<vmem>>, %arg9: memref<128x128xbf16, #tpu.memory_space<any>>, %arg10: memref<384x256xbf16, #tpu.memory_space<any>>, %arg11: memref<384x256xbf16, #tpu.memory_space<any>>, %arg12: memref<128x128xbf16, #tpu.memory_space<any>>, %arg13: memref<8x128xf32, #tpu.memory_space<vmem>>, %arg14: memref<8x128xf32, #tpu.memory_space<vmem>>, %arg15: memref<2x384x256xbf16, #tpu.memory_space<vmem>>, %arg16: memref<2x!tpu.dma_semaphore, #tpu.memory_space<semaphore_mem>>) attributes {dimension_semantics = [#tpu.dimension_semantics<parallel>], iteration_bounds = array<i64: 2>, scalar_prefetch = 0 : i64, scratch_operands = 2 : i64, tpu.core_type = #tpu.core_type<tc>, window_params = [{transform_indices = @transform_0, window_bounds = array<i64: 8, 128>}, {transform_indices = @transform_1, window_bounds = array<i64: 8, 1>}, {pipeline_mode = #tpu.pipeline_mode<synchronous>, transform_indices = @transform_2, window_bounds = array<i64: 1, 128>}, {pipeline_mode = #tpu.pipeline_mode<synchronous>, transform_indices = @transform_3, window_bounds = array<i64: 1, 128>}, {pipeline_mode = #tpu.pipeline_mode<synchronous>, transform_indices = @transform_4, window_bounds = array<i64: 1, 128>}, {pipeline_mode = #tpu.pipeline_mode<synchronous>, transform_indices = @transform_5, window_bounds = array<i64: 1, 128>}, {pipeline_mode = #tpu.pipeline_mode<synchronous>, transform_indices = @transform_6, window_bounds = array<i64: 1, 256>}, {pipeline_mode = #tpu.pipeline_mode<synchronous>, transform_indices = @transform_7, window_bounds = array<i64: 1, 256>}, {}, {}, {}, {}, {transform_indices = @transform_12, window_bounds = array<i64: 8, 128>}, {transform_indices = @transform_13, window_bounds = array<i64: 8, 128>}]} {
    %c0_i32 = arith.constant 0 : i32
    %c0_i32_0 = arith.constant 0 : i32
    %c0_i32_1 = arith.constant 0 : i32
    %c0_i32_2 = arith.constant 0 : i32
    %0 = tpu.memref_slice %arg15[%c0_i32, %c0_i32_1, %c0_i32_2] : memref<2x384x256xbf16, #tpu.memory_space<vmem>> -> memref<1x128x128xbf16, #tpu.memory_space<vmem>>
    %1 = tpu.memref_squeeze %0 : memref<1x128x128xbf16, #tpu.memory_space<vmem>> -> memref<128x128xbf16, #tpu.memory_space<vmem>>
    %2 = tpu.memref_slice %arg16[%c0_i32_0] : memref<2x!tpu.dma_semaphore, #tpu.memory_space<semaphore_mem>> -> memref<1x!tpu.dma_semaphore, #tpu.memory_space<semaphore_mem>>
    %3 = tpu.memref_squeeze %2 : memref<1x!tpu.dma_semaphore, #tpu.memory_space<semaphore_mem>> -> memref<!tpu.dma_semaphore, #tpu.memory_space<semaphore_mem>>
    tpu.enqueue_dma source(%arg9 : memref<128x128xbf16, #tpu.memory_space<any>>) target(%1 : memref<128x128xbf16, #tpu.memory_space<vmem>>) target_semaphore(%3 : memref<!tpu.dma_semaphore, #tpu.memory_space<semaphore_mem>>)
    %c0 = arith.constant 0 : index
    %c0_3 = arith.constant 0 : index
    %4 = vector.load %arg1[%c0, %c0_3] : memref<8x128xf32, #tpu.memory_space<vmem>>, vector<8x128xf32>
    %c0_4 = arith.constant 0 : index
    %c0_5 = arith.constant 0 : index
    %5 = vector.load %arg2[%c0_4, %c0_5] : memref<8x1xf32, #tpu.memory_space<vmem>>, vector<8x1xf32>
    %cst = arith.constant 1.000000e+00 : f32
    %6 = vector.broadcast %cst : f32 to vector<8x1xf32>
    %7 = arith.subf %6, %5 : vector<8x1xf32>
    %cst_6 = arith.constant dense<0.000000e+00> : vector<8xf32>
    %8 = vector.multi_reduction <add>, %4, %cst_6 [1] : vector<8x128xf32> to vector<8xf32>
    %9 = vector.shape_cast %8 : vector<8xf32> to vector<8x1xf32>
    %cst_7 = arith.constant 1.280000e+02 : f32
    %10 = vector.broadcast %cst_7 : f32 to vector<8x1xf32>
    %11 = arith.divf %9, %10 : vector<8x1xf32>
    %12 = vector.broadcast %11 : vector<8x1xf32> to vector<8x128xf32>
    %13 = arith.subf %4, %12 : vector<8x128xf32>
    %14 = arith.mulf %13, %13 : vector<8x128xf32>
    %cst_8 = arith.constant dense<0.000000e+00> : vector<8xf32>
    %15 = vector.multi_reduction <add>, %14, %cst_8 [1] : vector<8x128xf32> to vector<8xf32>
    %16 = vector.shape_cast %15 : vector<8xf32> to vector<8x1xf32>
    %cst_9 = arith.constant 1.280000e+02 : f32
    %17 = vector.broadcast %cst_9 : f32 to vector<8x1xf32>
    %18 = arith.divf %16, %17 : vector<8x1xf32>
    %19 = vector.broadcast %11 : vector<8x1xf32> to vector<8x128xf32>
    %20 = arith.subf %4, %19 : vector<8x128xf32>
    %cst_10 = arith.constant 9.99999974E-6 : f32
    %21 = vector.broadcast %cst_10 : f32 to vector<8x1xf32>
    %22 = arith.addf %18, %21 : vector<8x1xf32>
    %23 = math.rsqrt %22 : vector<8x1xf32>
    %24 = vector.broadcast %23 : vector<8x1xf32> to vector<8x128xf32>
    %25 = arith.mulf %20, %24 : vector<8x128xf32>
    %c0_11 = arith.constant 0 : index
    %c0_12 = arith.constant 0 : index
    %26 = vector.load %arg3[%c0_11, %c0_12] : memref<1x128xf32, #tpu.memory_space<vmem>>, vector<1x128xf32>
    %27 = vector.broadcast %26 : vector<1x128xf32> to vector<8x128xf32>
    %28 = arith.mulf %25, %27 : vector<8x128xf32>
    %c0_13 = arith.constant 0 : index
    %c0_14 = arith.constant 0 : index
    %29 = vector.load %arg4[%c0_13, %c0_14] : memref<1x128xf32, #tpu.memory_space<vmem>>, vector<1x128xf32>
    %30 = vector.broadcast %29 : vector<1x128xf32> to vector<8x128xf32>
    %31 = arith.addf %28, %30 : vector<8x128xf32>
    %c0_i32_15 = arith.constant 0 : i32
    %c0_i32_16 = arith.constant 0 : i32
    %c0_i32_17 = arith.constant 0 : i32
    %c0_i32_18 = arith.constant 0 : i32
    %32 = tpu.memref_slice %arg15[%c0_i32_15, %c0_i32_17, %c0_i32_18] : memref<2x384x256xbf16, #tpu.memory_space<vmem>> -> memref<1x128x128xbf16, #tpu.memory_space<vmem>>
    %33 = tpu.memref_squeeze %32 : memref<1x128x128xbf16, #tpu.memory_space<vmem>> -> memref<128x128xbf16, #tpu.memory_space<vmem>>
    %34 = tpu.memref_slice %arg16[%c0_i32_16] : memref<2x!tpu.dma_semaphore, #tpu.memory_space<semaphore_mem>> -> memref<1x!tpu.dma_semaphore, #tpu.memory_space<semaphore_mem>>
    %35 = tpu.memref_squeeze %34 : memref<1x!tpu.dma_semaphore, #tpu.memory_space<semaphore_mem>> -> memref<!tpu.dma_semaphore, #tpu.memory_space<semaphore_mem>>
    tpu.wait_dma2 semaphore(%35 : memref<!tpu.dma_semaphore, #tpu.memory_space<semaphore_mem>>) src(%arg9 : memref<128x128xbf16, #tpu.memory_space<any>>) dst(%33 : memref<128x128xbf16, #tpu.memory_space<vmem>>)
    %c0_19 = arith.constant 0 : index
    %c0_20 = arith.constant 0 : index
    %c0_21 = arith.constant 0 : index
    %36 = vector.load %arg15[%c0_19, %c0_20, %c0_21] : memref<2x384x256xbf16, #tpu.memory_space<vmem>>, vector<1x128x128xbf16>
    %37 = vector.shape_cast %36 : vector<1x128x128xbf16> to vector<128x128xbf16>
    %c1_i32 = arith.constant 1 : i32
    %c1_i32_22 = arith.constant 1 : i32
    %c0_i32_23 = arith.constant 0 : i32
    %c0_i32_24 = arith.constant 0 : i32
    %38 = tpu.memref_slice %arg15[%c1_i32, %c0_i32_23, %c0_i32_24] : memref<2x384x256xbf16, #tpu.memory_space<vmem>> -> memref<1x384x256xbf16, #tpu.memory_space<vmem>>
    %39 = tpu.memref_squeeze %38 : memref<1x384x256xbf16, #tpu.memory_space<vmem>> -> memref<384x256xbf16, #tpu.memory_space<vmem>>
    %40 = tpu.memref_slice %arg16[%c1_i32_22] : memref<2x!tpu.dma_semaphore, #tpu.memory_space<semaphore_mem>> -> memref<1x!tpu.dma_semaphore, #tpu.memory_space<semaphore_mem>>
    %41 = tpu.memref_squeeze %40 : memref<1x!tpu.dma_semaphore, #tpu.memory_space<semaphore_mem>> -> memref<!tpu.dma_semaphore, #tpu.memory_space<semaphore_mem>>
    tpu.enqueue_dma source(%arg10 : memref<384x256xbf16, #tpu.memory_space<any>>) target(%39 : memref<384x256xbf16, #tpu.memory_space<vmem>>) target_semaphore(%41 : memref<!tpu.dma_semaphore, #tpu.memory_space<semaphore_mem>>)
    %42 = arith.truncf %31 : vector<8x128xf32> to vector<8x128xbf16>
    %cst_25 = arith.constant dense<0.000000e+00> : vector<8x128xf32>
    %43 = tpu.matmul %42, %37, %cst_25 {dimension_numbers = #tpu.dot_dimension_numbers<[1], [0], [0], [1], [0, 0, 1, 1], [], []>} : vector<8x128xbf16>, vector<128x128xbf16>, vector<8x128xf32> -> vector<8x128xf32>
    %c0_26 = arith.constant 0 : index
    %c0_27 = arith.constant 0 : index
    %44 = vector.load %arg5[%c0_26, %c0_27] : memref<1x128xf32, #tpu.memory_space<vmem>>, vector<1x128xf32>
    %45 = vector.broadcast %44 : vector<1x128xf32> to vector<8x128xf32>
    %46 = arith.addf %43, %45 : vector<8x128xf32>
    %47 = tpu.iota {dimensions = array<i32: 0>} : vector<8x1xi32>
    %c8_i32 = arith.constant 8 : i32
    %c0_i32_28 = arith.constant 0 : i32
    %48 = arith.cmpi eq, %c8_i32, %c0_i32_28 : i32
    %c1_i32_29 = arith.constant 1 : i32
    %49 = arith.select %48, %c1_i32_29, %c8_i32 : i32
    %50 = vector.broadcast %49 : i32 to vector<8x1xi32>
    %51 = arith.remsi %47, %50 : vector<8x1xi32>
    %c0_i32_30 = arith.constant 0 : i32
    %52 = vector.broadcast %c0_i32_30 : i32 to vector<8x1xi32>
    %53 = arith.cmpi ne, %51, %52 : vector<8x1xi32>
    %c0_i32_31 = arith.constant 0 : i32
    %54 = vector.broadcast %c0_i32_31 : i32 to vector<8x1xi32>
    %55 = arith.cmpi slt, %51, %54 : vector<8x1xi32>
    %c0_i32_32 = arith.constant 0 : i32
    %56 = arith.cmpi slt, %49, %c0_i32_32 : i32
    %57 = vector.broadcast %56 : i1 to vector<8x1xi1>
    %58 = vector.broadcast %57 : vector<8x1xi1> to vector<8x1xi1>
    %59 = arith.xori %55, %58 : vector<8x1xi1>
    %60 = arith.andi %59, %53 : vector<8x1xi1>
    %61 = vector.broadcast %49 : i32 to vector<8x1xi32>
    %62 = arith.addi %51, %61 : vector<8x1xi32>
    %63 = arith.select %60, %62, %51 : vector<8x1xi1>, vector<8x1xi32>
    %c1_i32_33 = arith.constant 1 : i32
    %c1_i32_34 = arith.constant 1 : i32
    %c0_i32_35 = arith.constant 0 : i32
    %c0_i32_36 = arith.constant 0 : i32
    %64 = tpu.memref_slice %arg15[%c1_i32_33, %c0_i32_35, %c0_i32_36] : memref<2x384x256xbf16, #tpu.memory_space<vmem>> -> memref<1x384x256xbf16, #tpu.memory_space<vmem>>
    %65 = tpu.memref_squeeze %64 : memref<1x384x256xbf16, #tpu.memory_space<vmem>> -> memref<384x256xbf16, #tpu.memory_space<vmem>>
    %66 = tpu.memref_slice %arg16[%c1_i32_34] : memref<2x!tpu.dma_semaphore, #tpu.memory_space<semaphore_mem>> -> memref<1x!tpu.dma_semaphore, #tpu.memory_space<semaphore_mem>>
    %67 = tpu.memref_squeeze %66 : memref<1x!tpu.dma_semaphore, #tpu.memory_space<semaphore_mem>> -> memref<!tpu.dma_semaphore, #tpu.memory_space<semaphore_mem>>
    tpu.wait_dma2 semaphore(%67 : memref<!tpu.dma_semaphore, #tpu.memory_space<semaphore_mem>>) src(%arg10 : memref<384x256xbf16, #tpu.memory_space<any>>) dst(%65 : memref<384x256xbf16, #tpu.memory_space<vmem>>)
    %c1 = arith.constant 1 : index
    %c0_37 = arith.constant 0 : index
    %c0_38 = arith.constant 0 : index
    %68 = vector.load %arg15[%c1, %c0_37, %c0_38] : memref<2x384x256xbf16, #tpu.memory_space<vmem>>, vector<1x384x256xbf16>
    %69 = vector.shape_cast %68 : vector<1x384x256xbf16> to vector<384x256xbf16>
    %c0_i32_39 = arith.constant 0 : i32
    %c0_i32_40 = arith.constant 0 : i32
    %c0_i32_41 = arith.constant 0 : i32
    %c0_i32_42 = arith.constant 0 : i32
    %70 = tpu.memref_slice %arg15[%c0_i32_39, %c0_i32_41, %c0_i32_42] : memref<2x384x256xbf16, #tpu.memory_space<vmem>> -> memref<1x384x256xbf16, #tpu.memory_space<vmem>>
    %71 = tpu.memref_squeeze %70 : memref<1x384x256xbf16, #tpu.memory_space<vmem>> -> memref<384x256xbf16, #tpu.memory_space<vmem>>
    %72 = tpu.memref_slice %arg16[%c0_i32_40] : memref<2x!tpu.dma_semaphore, #tpu.memory_space<semaphore_mem>> -> memref<1x!tpu.dma_semaphore, #tpu.memory_space<semaphore_mem>>
    %73 = tpu.memref_squeeze %72 : memref<1x!tpu.dma_semaphore, #tpu.memory_space<semaphore_mem>> -> memref<!tpu.dma_semaphore, #tpu.memory_space<semaphore_mem>>
    tpu.enqueue_dma source(%arg11 : memref<384x256xbf16, #tpu.memory_space<any>>) target(%71 : memref<384x256xbf16, #tpu.memory_space<vmem>>) target_semaphore(%73 : memref<!tpu.dma_semaphore, #tpu.memory_space<semaphore_mem>>)
    %74 = vector.broadcast %7 : vector<8x1xf32> to vector<8x128xf32>
    %75 = arith.mulf %46, %74 : vector<8x128xf32>
    %c1_i32_43 = arith.constant 1 : i32
    %76 = tpu.dynamic_rotate %75 by %c1_i32_43 dim 0 : vector<8x128xf32>, i32 -> vector<8x128xf32>
    %c-1_i32 = arith.constant -1 : i32
    %77 = vector.broadcast %c-1_i32 : i32 to vector<8x1xi32>
    %78 = arith.addi %63, %77 : vector<8x1xi32>
    %c0_i32_44 = arith.constant 0 : i32
    %79 = vector.broadcast %c0_i32_44 : i32 to vector<8x1xi32>
    %80 = arith.cmpi sge, %78, %79 : vector<8x1xi32>
    %c-1_i32_45 = arith.constant -1 : i32
    %81 = vector.broadcast %c-1_i32_45 : i32 to vector<8x1xi32>
    %82 = arith.addi %63, %81 : vector<8x1xi32>
    %c8_i32_46 = arith.constant 8 : i32
    %83 = vector.broadcast %c8_i32_46 : i32 to vector<8x1xi32>
    %84 = arith.cmpi slt, %82, %83 : vector<8x1xi32>
    %85 = arith.andi %80, %84 : vector<8x1xi1>
    %cst_47 = arith.constant 0.000000e+00 : f32
    %86 = vector.shape_cast %85 : vector<8x1xi1> to vector<8x1xi1>
    %87 = vector.broadcast %86 : vector<8x1xi1> to vector<8x128xi1>
    %88 = vector.broadcast %cst_47 : f32 to vector<8x128xf32>
    %89 = arith.select %87, %76, %88 : vector<8x128xi1>, vector<8x128xf32>
    %90 = arith.truncf %89 : vector<8x128xf32> to vector<8x128xbf16>
    %c0_i32_48 = arith.constant 0 : i32
    %91 = vector.broadcast %c0_i32_48 : i32 to vector<8x1xi32>
    %92 = arith.addi %63, %91 : vector<8x1xi32>
    %c0_i32_49 = arith.constant 0 : i32
    %93 = vector.broadcast %c0_i32_49 : i32 to vector<8x1xi32>
    %94 = arith.cmpi sge, %92, %93 : vector<8x1xi32>
    %c0_i32_50 = arith.constant 0 : i32
    %95 = vector.broadcast %c0_i32_50 : i32 to vector<8x1xi32>
    %96 = arith.addi %63, %95 : vector<8x1xi32>
    %c8_i32_51 = arith.constant 8 : i32
    %97 = vector.broadcast %c8_i32_51 : i32 to vector<8x1xi32>
    %98 = arith.cmpi slt, %96, %97 : vector<8x1xi32>
    %99 = arith.andi %94, %98 : vector<8x1xi1>
    %cst_52 = arith.constant 0.000000e+00 : f32
    %100 = vector.shape_cast %99 : vector<8x1xi1> to vector<8x1xi1>
    %101 = vector.broadcast %100 : vector<8x1xi1> to vector<8x128xi1>
    %102 = vector.broadcast %cst_52 : f32 to vector<8x128xf32>
    %103 = arith.select %101, %75, %102 : vector<8x128xi1>, vector<8x128xf32>
    %104 = arith.truncf %103 : vector<8x128xf32> to vector<8x128xbf16>
    %c7_i32 = arith.constant 7 : i32
    %105 = tpu.dynamic_rotate %75 by %c7_i32 dim 0 : vector<8x128xf32>, i32 -> vector<8x128xf32>
    %c1_i32_53 = arith.constant 1 : i32
    %106 = vector.broadcast %c1_i32_53 : i32 to vector<8x1xi32>
    %107 = arith.addi %63, %106 : vector<8x1xi32>
    %c0_i32_54 = arith.constant 0 : i32
    %108 = vector.broadcast %c0_i32_54 : i32 to vector<8x1xi32>
    %109 = arith.cmpi sge, %107, %108 : vector<8x1xi32>
    %c1_i32_55 = arith.constant 1 : i32
    %110 = vector.broadcast %c1_i32_55 : i32 to vector<8x1xi32>
    %111 = arith.addi %63, %110 : vector<8x1xi32>
    %c8_i32_56 = arith.constant 8 : i32
    %112 = vector.broadcast %c8_i32_56 : i32 to vector<8x1xi32>
    %113 = arith.cmpi slt, %111, %112 : vector<8x1xi32>
    %114 = arith.andi %109, %113 : vector<8x1xi1>
    %cst_57 = arith.constant 0.000000e+00 : f32
    %115 = vector.shape_cast %114 : vector<8x1xi1> to vector<8x1xi1>
    %116 = vector.broadcast %115 : vector<8x1xi1> to vector<8x128xi1>
    %117 = vector.broadcast %cst_57 : f32 to vector<8x128xf32>
    %118 = arith.select %116, %105, %117 : vector<8x128xi1>, vector<8x128xf32>
    %119 = arith.truncf %118 : vector<8x128xf32> to vector<8x128xbf16>
    %120 = tpu.concatenate %90, %104, %119 in 1 : vector<8x128xbf16>, vector<8x128xbf16>, vector<8x128xbf16> -> vector<8x384xbf16>
    %cst_58 = arith.constant dense<0.000000e+00> : vector<8x256xf32>
    %121 = tpu.matmul %120, %69, %cst_58 {dimension_numbers = #tpu.dot_dimension_numbers<[1], [0], [0], [1], [0, 0, 1, 1], [], []>} : vector<8x384xbf16>, vector<384x256xbf16>, vector<8x256xf32> -> vector<8x256xf32>
    %c0_59 = arith.constant 0 : index
    %c0_60 = arith.constant 0 : index
    %122 = vector.load %arg7[%c0_59, %c0_60] : memref<1x256xf32, #tpu.memory_space<vmem>>, vector<1x256xf32>
    %123 = vector.broadcast %122 : vector<1x256xf32> to vector<8x256xf32>
    %124 = arith.addf %121, %123 : vector<8x256xf32>
    %125 = vector.extract_strided_slice %124 {offsets = [0, 0], sizes = [8, 128], strides = [1, 1]} : vector<8x256xf32> to vector<8x128xf32>
    %126 = vector.extract_strided_slice %124 {offsets = [0, 128], sizes = [8, 128], strides = [1, 1]} : vector<8x256xf32> to vector<8x128xf32>
    %127 = arith.negf %126 : vector<8x128xf32>
    %128 = math.exp %127 : vector<8x128xf32>
    %cst_61 = arith.constant 1.000000e+00 : f32
    %129 = vector.broadcast %cst_61 : f32 to vector<8x128xf32>
    %130 = arith.addf %129, %128 : vector<8x128xf32>
    %131 = arith.divf %129, %130 : vector<8x128xf32>
    %132 = arith.mulf %125, %131 : vector<8x128xf32>
    %c0_i32_62 = arith.constant 0 : i32
    %c0_i32_63 = arith.constant 0 : i32
    %c0_i32_64 = arith.constant 0 : i32
    %c0_i32_65 = arith.constant 0 : i32
    %133 = tpu.memref_slice %arg15[%c0_i32_62, %c0_i32_64, %c0_i32_65] : memref<2x384x256xbf16, #tpu.memory_space<vmem>> -> memref<1x384x256xbf16, #tpu.memory_space<vmem>>
    %134 = tpu.memref_squeeze %133 : memref<1x384x256xbf16, #tpu.memory_space<vmem>> -> memref<384x256xbf16, #tpu.memory_space<vmem>>
    %135 = tpu.memref_slice %arg16[%c0_i32_63] : memref<2x!tpu.dma_semaphore, #tpu.memory_space<semaphore_mem>> -> memref<1x!tpu.dma_semaphore, #tpu.memory_space<semaphore_mem>>
    %136 = tpu.memref_squeeze %135 : memref<1x!tpu.dma_semaphore, #tpu.memory_space<semaphore_mem>> -> memref<!tpu.dma_semaphore, #tpu.memory_space<semaphore_mem>>
    tpu.wait_dma2 semaphore(%136 : memref<!tpu.dma_semaphore, #tpu.memory_space<semaphore_mem>>) src(%arg11 : memref<384x256xbf16, #tpu.memory_space<any>>) dst(%134 : memref<384x256xbf16, #tpu.memory_space<vmem>>)
    %c0_66 = arith.constant 0 : index
    %c0_67 = arith.constant 0 : index
    %c0_68 = arith.constant 0 : index
    %137 = vector.load %arg15[%c0_66, %c0_67, %c0_68] : memref<2x384x256xbf16, #tpu.memory_space<vmem>>, vector<1x384x256xbf16>
    %138 = vector.shape_cast %137 : vector<1x384x256xbf16> to vector<384x256xbf16>
    %c1_i32_69 = arith.constant 1 : i32
    %c1_i32_70 = arith.constant 1 : i32
    %c0_i32_71 = arith.constant 0 : i32
    %c0_i32_72 = arith.constant 0 : i32
    %139 = tpu.memref_slice %arg15[%c1_i32_69, %c0_i32_71, %c0_i32_72] : memref<2x384x256xbf16, #tpu.memory_space<vmem>> -> memref<1x128x128xbf16, #tpu.memory_space<vmem>>
    %140 = tpu.memref_squeeze %139 : memref<1x128x128xbf16, #tpu.memory_space<vmem>> -> memref<128x128xbf16, #tpu.memory_space<vmem>>
    %141 = tpu.memref_slice %arg16[%c1_i32_70] : memref<2x!tpu.dma_semaphore, #tpu.memory_space<semaphore_mem>> -> memref<1x!tpu.dma_semaphore, #tpu.memory_space<semaphore_mem>>
    %142 = tpu.memref_squeeze %141 : memref<1x!tpu.dma_semaphore, #tpu.memory_space<semaphore_mem>> -> memref<!tpu.dma_semaphore, #tpu.memory_space<semaphore_mem>>
    tpu.enqueue_dma source(%arg12 : memref<128x128xbf16, #tpu.memory_space<any>>) target(%140 : memref<128x128xbf16, #tpu.memory_space<vmem>>) target_semaphore(%142 : memref<!tpu.dma_semaphore, #tpu.memory_space<semaphore_mem>>)
    %143 = vector.broadcast %7 : vector<8x1xf32> to vector<8x128xf32>
    %144 = arith.mulf %132, %143 : vector<8x128xf32>
    %c1_i32_73 = arith.constant 1 : i32
    %145 = tpu.dynamic_rotate %144 by %c1_i32_73 dim 0 : vector<8x128xf32>, i32 -> vector<8x128xf32>
    %c-1_i32_74 = arith.constant -1 : i32
    %146 = vector.broadcast %c-1_i32_74 : i32 to vector<8x1xi32>
    %147 = arith.addi %63, %146 : vector<8x1xi32>
    %c0_i32_75 = arith.constant 0 : i32
    %148 = vector.broadcast %c0_i32_75 : i32 to vector<8x1xi32>
    %149 = arith.cmpi sge, %147, %148 : vector<8x1xi32>
    %c-1_i32_76 = arith.constant -1 : i32
    %150 = vector.broadcast %c-1_i32_76 : i32 to vector<8x1xi32>
    %151 = arith.addi %63, %150 : vector<8x1xi32>
    %c8_i32_77 = arith.constant 8 : i32
    %152 = vector.broadcast %c8_i32_77 : i32 to vector<8x1xi32>
    %153 = arith.cmpi slt, %151, %152 : vector<8x1xi32>
    %154 = arith.andi %149, %153 : vector<8x1xi1>
    %cst_78 = arith.constant 0.000000e+00 : f32
    %155 = vector.shape_cast %154 : vector<8x1xi1> to vector<8x1xi1>
    %156 = vector.broadcast %155 : vector<8x1xi1> to vector<8x128xi1>
    %157 = vector.broadcast %cst_78 : f32 to vector<8x128xf32>
    %158 = arith.select %156, %145, %157 : vector<8x128xi1>, vector<8x128xf32>
    %159 = arith.truncf %158 : vector<8x128xf32> to vector<8x128xbf16>
    %c0_i32_79 = arith.constant 0 : i32
    %160 = vector.broadcast %c0_i32_79 : i32 to vector<8x1xi32>
    %161 = arith.addi %63, %160 : vector<8x1xi32>
    %c0_i32_80 = arith.constant 0 : i32
    %162 = vector.broadcast %c0_i32_80 : i32 to vector<8x1xi32>
    %163 = arith.cmpi sge, %161, %162 : vector<8x1xi32>
    %c0_i32_81 = arith.constant 0 : i32
    %164 = vector.broadcast %c0_i32_81 : i32 to vector<8x1xi32>
    %165 = arith.addi %63, %164 : vector<8x1xi32>
    %c8_i32_82 = arith.constant 8 : i32
    %166 = vector.broadcast %c8_i32_82 : i32 to vector<8x1xi32>
    %167 = arith.cmpi slt, %165, %166 : vector<8x1xi32>
    %168 = arith.andi %163, %167 : vector<8x1xi1>
    %cst_83 = arith.constant 0.000000e+00 : f32
    %169 = vector.shape_cast %168 : vector<8x1xi1> to vector<8x1xi1>
    %170 = vector.broadcast %169 : vector<8x1xi1> to vector<8x128xi1>
    %171 = vector.broadcast %cst_83 : f32 to vector<8x128xf32>
    %172 = arith.select %170, %144, %171 : vector<8x128xi1>, vector<8x128xf32>
    %173 = arith.truncf %172 : vector<8x128xf32> to vector<8x128xbf16>
    %c7_i32_84 = arith.constant 7 : i32
    %174 = tpu.dynamic_rotate %144 by %c7_i32_84 dim 0 : vector<8x128xf32>, i32 -> vector<8x128xf32>
    %c1_i32_85 = arith.constant 1 : i32
    %175 = vector.broadcast %c1_i32_85 : i32 to vector<8x1xi32>
    %176 = arith.addi %63, %175 : vector<8x1xi32>
    %c0_i32_86 = arith.constant 0 : i32
    %177 = vector.broadcast %c0_i32_86 : i32 to vector<8x1xi32>
    %178 = arith.cmpi sge, %176, %177 : vector<8x1xi32>
    %c1_i32_87 = arith.constant 1 : i32
    %179 = vector.broadcast %c1_i32_87 : i32 to vector<8x1xi32>
    %180 = arith.addi %63, %179 : vector<8x1xi32>
    %c8_i32_88 = arith.constant 8 : i32
    %181 = vector.broadcast %c8_i32_88 : i32 to vector<8x1xi32>
    %182 = arith.cmpi slt, %180, %181 : vector<8x1xi32>
    %183 = arith.andi %178, %182 : vector<8x1xi1>
    %cst_89 = arith.constant 0.000000e+00 : f32
    %184 = vector.shape_cast %183 : vector<8x1xi1> to vector<8x1xi1>
    %185 = vector.broadcast %184 : vector<8x1xi1> to vector<8x128xi1>
    %186 = vector.broadcast %cst_89 : f32 to vector<8x128xf32>
    %187 = arith.select %185, %174, %186 : vector<8x128xi1>, vector<8x128xf32>
    %188 = arith.truncf %187 : vector<8x128xf32> to vector<8x128xbf16>
    %189 = tpu.concatenate %159, %173, %188 in 1 : vector<8x128xbf16>, vector<8x128xbf16>, vector<8x128xbf16> -> vector<8x384xbf16>
    %cst_90 = arith.constant dense<0.000000e+00> : vector<8x256xf32>
    %190 = tpu.matmul %189, %138, %cst_90 {dimension_numbers = #tpu.dot_dimension_numbers<[1], [0], [0], [1], [0, 0, 1, 1], [], []>} : vector<8x384xbf16>, vector<384x256xbf16>, vector<8x256xf32> -> vector<8x256xf32>
    %c0_91 = arith.constant 0 : index
    %c0_92 = arith.constant 0 : index
    %191 = vector.load %arg8[%c0_91, %c0_92] : memref<1x256xf32, #tpu.memory_space<vmem>>, vector<1x256xf32>
    %192 = vector.broadcast %191 : vector<1x256xf32> to vector<8x256xf32>
    %193 = arith.addf %190, %192 : vector<8x256xf32>
    %194 = vector.extract_strided_slice %193 {offsets = [0, 0], sizes = [8, 128], strides = [1, 1]} : vector<8x256xf32> to vector<8x128xf32>
    %195 = vector.extract_strided_slice %193 {offsets = [0, 128], sizes = [8, 128], strides = [1, 1]} : vector<8x256xf32> to vector<8x128xf32>
    %196 = arith.negf %195 : vector<8x128xf32>
    %197 = math.exp %196 : vector<8x128xf32>
    %cst_93 = arith.constant 1.000000e+00 : f32
    %198 = vector.broadcast %cst_93 : f32 to vector<8x128xf32>
    %199 = arith.addf %198, %197 : vector<8x128xf32>
    %200 = arith.divf %198, %199 : vector<8x128xf32>
    %201 = arith.mulf %194, %200 : vector<8x128xf32>
    %c1_i32_94 = arith.constant 1 : i32
    %c1_i32_95 = arith.constant 1 : i32
    %c0_i32_96 = arith.constant 0 : i32
    %c0_i32_97 = arith.constant 0 : i32
    %202 = tpu.memref_slice %arg15[%c1_i32_94, %c0_i32_96, %c0_i32_97] : memref<2x384x256xbf16, #tpu.memory_space<vmem>> -> memref<1x128x128xbf16, #tpu.memory_space<vmem>>
    %203 = tpu.memref_squeeze %202 : memref<1x128x128xbf16, #tpu.memory_space<vmem>> -> memref<128x128xbf16, #tpu.memory_space<vmem>>
    %204 = tpu.memref_slice %arg16[%c1_i32_95] : memref<2x!tpu.dma_semaphore, #tpu.memory_space<semaphore_mem>> -> memref<1x!tpu.dma_semaphore, #tpu.memory_space<semaphore_mem>>
    %205 = tpu.memref_squeeze %204 : memref<1x!tpu.dma_semaphore, #tpu.memory_space<semaphore_mem>> -> memref<!tpu.dma_semaphore, #tpu.memory_space<semaphore_mem>>
    tpu.wait_dma2 semaphore(%205 : memref<!tpu.dma_semaphore, #tpu.memory_space<semaphore_mem>>) src(%arg12 : memref<128x128xbf16, #tpu.memory_space<any>>) dst(%203 : memref<128x128xbf16, #tpu.memory_space<vmem>>)
    %c1_98 = arith.constant 1 : index
    %c0_99 = arith.constant 0 : index
    %c0_100 = arith.constant 0 : index
    %206 = vector.load %arg15[%c1_98, %c0_99, %c0_100] : memref<2x384x256xbf16, #tpu.memory_space<vmem>>, vector<1x128x128xbf16>
    %207 = vector.shape_cast %206 : vector<1x128x128xbf16> to vector<128x128xbf16>
    %208 = arith.truncf %201 : vector<8x128xf32> to vector<8x128xbf16>
    %cst_101 = arith.constant dense<0.000000e+00> : vector<8x128xf32>
    %209 = tpu.matmul %208, %207, %cst_101 {dimension_numbers = #tpu.dot_dimension_numbers<[1], [0], [0], [1], [0, 0, 1, 1], [], []>} : vector<8x128xbf16>, vector<128x128xbf16>, vector<8x128xf32> -> vector<8x128xf32>
    %c0_102 = arith.constant 0 : index
    %c0_103 = arith.constant 0 : index
    %210 = vector.load %arg6[%c0_102, %c0_103] : memref<1x128xf32, #tpu.memory_space<vmem>>, vector<1x128xf32>
    %211 = vector.broadcast %210 : vector<1x128xf32> to vector<8x128xf32>
    %212 = arith.addf %209, %211 : vector<8x128xf32>
    %213 = vector.broadcast %7 : vector<8x1xf32> to vector<8x128xf32>
    %214 = arith.mulf %212, %213 : vector<8x128xf32>
    %c0_104 = arith.constant 0 : index
    %c0_105 = arith.constant 0 : index
    %215 = vector.load %arg13[%c0_104, %c0_105] : memref<8x128xf32, #tpu.memory_space<vmem>>, vector<8x128xf32>
    tpu.vector_store %arg13[%c0_104, %c0_105], %214 {strides = array<i32>} : memref<8x128xf32, #tpu.memory_space<vmem>>, vector<8x128xf32>,
    %216 = arith.addf %214, %31 : vector<8x128xf32>
    %cst_106 = arith.constant 0.707106769 : f32
    %217 = vector.broadcast %cst_106 : f32 to vector<8x128xf32>
    %218 = arith.mulf %216, %217 : vector<8x128xf32>
    %c0_107 = arith.constant 0 : index
    %c0_108 = arith.constant 0 : index
    %219 = vector.load %arg14[%c0_107, %c0_108] : memref<8x128xf32, #tpu.memory_space<vmem>>, vector<8x128xf32>
    tpu.vector_store %arg14[%c0_107, %c0_108], %218 {strides = array<i32>} : memref<8x128xf32, #tpu.memory_space<vmem>>, vector<8x128xf32>,
    return
  }
  func.func @transform_0(%arg0: i32) -> (i32, i32) {
    %c0_i32 = arith.constant 0 : i32
    %c0_i32_0 = arith.constant 0 : i32
    return %arg0, %c0_i32 : i32, i32
  }
  func.func @transform_1(%arg0: i32) -> (i32, i32) {
    %c0_i32 = arith.constant 0 : i32
    %c0_i32_0 = arith.constant 0 : i32
    return %arg0, %c0_i32 : i32, i32
  }
  func.func @transform_2(%arg0: i32) -> (i32, i32) {
    %c0_i32 = arith.constant 0 : i32
    %c0_i32_0 = arith.constant 0 : i32
    %c0_i32_1 = arith.constant 0 : i32
    return %c0_i32, %c0_i32_0 : i32, i32
  }
  func.func @transform_3(%arg0: i32) -> (i32, i32) {
    %c0_i32 = arith.constant 0 : i32
    %c0_i32_0 = arith.constant 0 : i32
    %c0_i32_1 = arith.constant 0 : i32
    return %c0_i32, %c0_i32_0 : i32, i32
  }
  func.func @transform_4(%arg0: i32) -> (i32, i32) {
    %c0_i32 = arith.constant 0 : i32
    %c0_i32_0 = arith.constant 0 : i32
    %c0_i32_1 = arith.constant 0 : i32
    return %c0_i32, %c0_i32_0 : i32, i32
  }
  func.func @transform_5(%arg0: i32) -> (i32, i32) {
    %c0_i32 = arith.constant 0 : i32
    %c0_i32_0 = arith.constant 0 : i32
    %c0_i32_1 = arith.constant 0 : i32
    return %c0_i32, %c0_i32_0 : i32, i32
  }
  func.func @transform_6(%arg0: i32) -> (i32, i32) {
    %c0_i32 = arith.constant 0 : i32
    %c0_i32_0 = arith.constant 0 : i32
    %c0_i32_1 = arith.constant 0 : i32
    return %c0_i32, %c0_i32_0 : i32, i32
  }
  func.func @transform_7(%arg0: i32) -> (i32, i32) {
    %c0_i32 = arith.constant 0 : i32
    %c0_i32_0 = arith.constant 0 : i32
    %c0_i32_1 = arith.constant 0 : i32
    return %c0_i32, %c0_i32_0 : i32, i32
  }
  func.func @transform_12(%arg0: i32) -> (i32, i32) {
    %c0_i32 = arith.constant 0 : i32
    %c0_i32_0 = arith.constant 0 : i32
    return %arg0, %c0_i32 : i32, i32
  }
  func.func @transform_13(%arg0: i32) -> (i32, i32) {
    %c0_i32 = arith.constant 0 : i32
    %c0_i32_0 = arith.constant 0 : i32
    return %arg0, %c0_i32 : i32, i32
  }
}

</mosaic_0001>

<bundles_post_ra>
// kernel: tpu_custom_call.1
= control target key start
LH: loop header
LB: loop body
LE: loop exit
PB: predicated region body
PF: predicated region fallthrough
CT: control target
= control target key end

     0   :  { %s3020_s0 = inlined_call_operand.vmem [shape: f32[16,128], index: 0, kind: input, shape index: {}]   ;;  %s3021_s1 = inlined_call_operand.vmem [shape: f32[16,1], index: 1, kind: input, shape index: {}]   ;;  %s3022_s2 = inlined_call_operand.hbm [shape: f32[1,128], index: 2, kind: input, shape index: {}]   ;;  %s3023_s3 = inlined_call_operand.hbm [shape: f32[1,128], index: 3, kind: input, shape index: {}]   ;;  %s3024_s4 = inlined_call_operand.hbm [shape: f32[1,128], index: 4, kind: input, shape index: {}]   ;;  %s3025_s5 = inlined_call_operand.vmem [shape: f32[1,128], index: 5, kind: input, shape index: {}]   ;;  %s3026_s6 = inlined_call_operand.vmem [shape: f32[1,256], index: 6, kind: input, shape index: {}]   ;;  %s3027_s7 = inlined_call_operand.vmem [shape: f32[1,256], index: 7, kind: input, shape index: {}]   ;;  %s3028_s8 = inlined_call_operand.hbm [shape: bf16[128,128], index: 8, kind: input, shape index: {}]   ;;  %s3029_s9 = inlined_call_operand.hbm [shape: bf16[384,256], index: 9, kind: input, shape index: {}]   ;;  %s3030_s10 = inlined_call_operand.hbm [shape: bf16[384,256], index: 10, kind: input, shape index: {}]   ;;  %s3031_s11 = inlined_call_operand.hbm [shape: bf16[128,128], index: 11, kind: input, shape index: {}]   ;;  %s3032_s12 = inlined_call_operand.hbm [shape: f32[16,128], index: 12, kind: output, shape index: {0}]   ;;  %s3033_s13 = inlined_call_operand.hbm [shape: f32[16,128], index: 13, kind: output, shape index: {1}]  }
   0x1   :  { %3038 = sst [smem:[#allocation33_spill]] %s3020_s0 }
   0x2   :  { %3039 = sst [smem:[#allocation34_spill]] %s3021_s1 }
   0x3   :  { %3040 = sst [smem:[#allocation35_spill]] %s3023_s3 }
   0x4   :  { %19 = vsyncpa [#allocation5], 0 }
   0x5   :  { %20 = vsyncpa [#allocation8], 0 }
   0x6   :  { %21 = vsyncpa [#allocation6], 0 }
   0x7   :  { %23 = vsyncpa [#allocation6 + $0x1], 0 }
   0x8   :  { %24 = vsyncpa [#allocation12], 0 }
   0x9   :  { %26 = vsyncpa [#allocation12 + $0x1], 0  ;;  %s2775_s25 = smov 0   ;;  %s2777_s26 = smov 0  }
   0xa   :  { %s2779_s27 = smov 0   ;;  %s2781_s28 = smov 0  }
   0xb LB: > { %3041 = sst [smem:[#allocation29_spill]] %s2689_s27  ;;  %s2796_s29 = sadd.s32 4294967295, %s2693_s28   ;;  %s2693_s28 = sphi %s2781_s28, %s3056_s28   ;;  %s2689_s27 = sphi %s2779_s27, %s3058_s27   ;;  %s2685_s26 = sphi %s2777_s26, %s3060_s26   ;;  %s2681_s25 = sphi %s2775_s25, %s3059_s25  }
   0xc   : > { %s1690_s30 = sadd.s32 4294967294, %s2693_s28   ;;  %s2800_s14 = sadd.s32 1, %s2693_s28  }
   0xd   : > { %3042 = sst [smem:[#allocation30_spill]] %s2800_s14  ;;  %s217_s15 = sadd.s32 1, %s2689_s27 }
   0xe   : > { %s214_s16 = ssub.s32 %s2693_s28, %s2800_s14  ;;  %p227_p0 = scmp.ne.s32.totalorder %s2689_s27, %s2685_s26 }
   0xf   : > { %p215_p1 = scmp.eq.s32.totalorder %s214_s16, 0  ;;  %p228_p2 = scmp.eq.s32.totalorder %s2796_s29, 1 }
  0x10   : > { %p233_p3 = scmp.ne.s32.totalorder %s2685_s26, %s2681_s25  ;;  %p234_p4 = scmp.eq.s32.totalorder %s1690_s30, 1 }
  0x11   : > { %s2811_s17 = scalar_select %p215_p1, %s2689_s27, %s217_s15  }
  0x12   : > { %p2813_p5 = por %p228_p2, %p227_p0  ;;  %p2817_p6 = por %p234_p4, %p233_p3 }
  0x13   : > { %3043 = sst [smem:[#allocation31_spill]] %s2811_s17  ;;  %p1691_p7 = scmp.ge.s32.totalorder %s2693_s28, 1 }
  0x14   : > { %s3045_s19 = scalar_select %p2817_p6, 1, 0 }
  0x15   : > { %p267_p8 = scmp.lt.s32.totalorder %s2693_s28, 3  ;;  %p2331_p9 = scmp.eq.s32.totalorder %s2796_s29, 0 }
  0x16   : > { %3046 = sst [smem:[#allocation32_spill]] %s3045_s19  ;;  %s2695_s24 = smov [#allocation7]  }
  0x17   : > { %p2824_p10 = pnand %p1691_p7, %p267_p8  ;;  %s3048_s3 = sld [smem:[#allocation35_spill]] }
  0x18   : > { %s293_s30 = sshll.u32 %s2695_s24, 4  ;;  %s279_s17 = sshll.u32 %s3022_s2, 4  ;;  %s294_s30 = int_to_ptr.vmem [resolvable:$true] %s293_s30  ;;  %s280_s17 = int_to_ptr.hbm [resolvable:$true] %s279_s17 }
  0x19   : > { %p2314_p11 = pneg %p2824_p10  ;;  %s303_s19 = sshll.u32 %s3024_s4, 4  ;;  %s304_s19 = int_to_ptr.hbm [resolvable:$true] %s303_s19 }
  0x1a   : > { %s2696_s21 = smov [#allocation4]  }
  0x1b   : > { %p2315_p12 = pnand %p2331_p9, %p2314_p11  ;;  %s281_s22 = sshll.u32 %s2696_s21, 4  ;;  %s282_s22 = int_to_ptr.vmem [resolvable:$true] %s281_s22 }
  0x1d   : > { %s291_s23 = sshll.u32 %s3048_s3, 4  ;;  %s2697_s3 = smov [#allocation9]   ;;  %s292_s23 = int_to_ptr.hbm [resolvable:$true] %s291_s23 }
  0x1e   : > { %2320 = dma.hbm_to_vmem [thread:$0]  (!%p2315_p12), %s292_s23, 16, %s294_s30, [#allocation8]  }
  0x1f   : > { %2317 = dma.hbm_to_vmem [thread:$0]  (!%p2315_p12), %s280_s17, 16, %s282_s22, [#allocation5]  }
  0x20   : > { %s305_s24 = sshll.u32 %s2697_s3, 4  ;;  %341 = sbr.rel (%p2824_p10) target bundleno = 1195 (0x4ab), region = 52  ;;  %s306_s24 = int_to_ptr.vmem [resolvable:$true] %s305_s24 }
  0x21   : > { %2323 = dma.hbm_to_vmem [thread:$0]  (!%p2315_p12), %s304_s19, 16, %s306_s24, [#allocation8]  }
  0x25   : > { %2656 = dma.done.wait (%p2331_p9), [#allocation5], 16  }
  0x26   : > { %2658 = vsyncadd (%p2331_p9), [#allocation5], 4294967280 }
  0x27   : > { %2660 = dma.done.wait (%p2331_p9), [#allocation8], 32  }
  0x28   : > { %2662 = vsyncadd (%p2331_p9), [#allocation8], 4294967264  ;;  %p396_p13 = scmp.lt.s32.totalorder %s2796_s29, 1  ;;  %s3049_s0 = sld [smem:[#allocation33_spill]]  ;;  %v2698_v3 = vmov 128.0  }
  0x29   : > { %s3050_s1 = sld [smem:[#allocation34_spill]]  ;;  %2382 = vrcp.f32 %v2698_v3  ;;  %s2863_s15 = sand.u32 1, %s2685_s26   ;;  %v2380_v23 = vld [vmem:[#allocation4] ss:$0 sm:$0xff]  ;;  %v2381_v25 = vld [vmem:[#allocation7] ss:$0 sm:$0xff] }
  0x2a   : > { %s397_s3 = scalar_select %p396_p13, %s2796_s29, 1 }
  0x2b   : > { %s404_s22 = sshll.u32 %s3028_s8, 4  ;;  %s1700_s24 = sshll.u32 %s2863_s15, 3  ;;  %s405_s22 = int_to_ptr.hbm [resolvable:$true] %s404_s22 }
  0x2c   : > { %s1702_s27 = sshll.u32 %s397_s3, 3  ;;  %s2699_s3 = smov [#allocation2]  }
  0x2d   : > { %s2700_s14 = smov 64   ;;  %s2701_s17 = smov 128  }
  0x2e   : > { %s399_s19 = scalar_lea.vmem %s3049_s0, %s1702_s27  ;;  %s2879_s20 = scalar_lea.vmem [#allocation10], %s1700_s24 }
  0x2f   : > { %s403_s30 = scalar_lea.vmem %s3050_s1, %s1702_s27  ;;  %v412_v0 = vld [vmem:[%s399_s19] sm:$0xff]  ;;  %v2383_v4 = vpop.eup %2382  ;;  %s2869_s27 = sshll.u32 %s2699_s3, 4  ;;  %s407_s27 = int_to_ptr.vmem [resolvable:$true] %s2869_s27 }
  0x30   : > { %v2859_v1 = vld [vmem:[%s403_s30] sm:$0xff]  ;;  %415 = vadd.xlane.f32.xlu0 %v412_v0  ;;  %v418_v5 = vmul.f32 128.0, %v2383_v4  ;;  %vm422_vm0 = vweird.f32 %v2383_v4  ;;  %s2702_s19 = smov 4   ;;  %s2881_s23 = scalar_lea.vmem [#allocation11], %s1700_s24 }
  0x31   : > { %v414_v2 = vsub.f32 1.0, %v2859_v1  ;;  %411 = dma.hbm_to_vmem [thread:$0]  %s405_s22, 1024, %s407_s27, [#allocation3], %s2700_s14, %s2701_s17, %s2702_s19 }
  0x32   : > { %v419_v6 = vsub.f32 1.0, %v418_v5 }
  0x34   : > { %v420_v7 = vmul.f32 %v2383_v4, %v419_v6 }
  0x36   : > { %v421_v8 = vadd.f32 %v2383_v4, %v420_v7 }
  0x38   : > { %v423_v9 = vsel %vm422_vm0, %v2383_v4, %v421_v8 }
  0xa3   : > { %v416_v10 = vpop.xlane.xlu0 %415 }
  0xa4   : > { %v424_v11 = vmul.f32 %v423_v9, %v416_v10 }
  0xa6   : > { %v425_v12 = vsub.f32 %v412_v0, %v424_v11 }
  0xa8   : > { %v426_v13 = vmul.f32 %v425_v12, %v425_v12 }
  0xaa   : > { %427 = vadd.xlane.f32.xlu0 %v426_v13 }
 0x11d   : > { %v428_v14 = vpop.xlane.xlu0 %427 }
 0x11e   : > { %v429_v15 = vmul.f32 %v428_v14, %v423_v9 }
 0x120   : > { %v430_v16 = vadd.f32 1e-05, %v429_v15 }
 0x122   : > { %2384 = vrsqrt.f32 %v430_v16  ;;  %vm437_vm2 = vweird.f32 %v430_v16 }
 0x128   : > { %v2385_v17 = vpop.eup %2384 }
 0x129   : > { %v432_v18 = vmul.f32 %v2385_v17, %v430_v16  ;;  %vm438_vm1 = vweird.f32 %v2385_v17 }
 0x12a   : > { %vm439_vm3 = vmor %vm437_vm2, %vm438_vm1 }
 0x12b   : > { %v433_v19 = vmul.f32 %v2385_v17, %v432_v18 }
 0x12d   : > { %v434_v20 = vmul.f32 0.5, %v433_v19 }
 0x12f   : > { %v435_v21 = vsub.f32 1.5, %v434_v20 }
 0x131   : > { %v436_v22 = vmul.f32 %v2385_v17, %v435_v21 }
 0x133   : > { %v440_v24 = vsel %vm439_vm3, %v2385_v17, %v436_v22 }
 0x134   : > { %v441_v26 = vmul.f32 %v440_v24, %v425_v12 }
 0x136   : > { %v446_v27 = vmul.f32 %v2380_v23, %v441_v26 }
 0x138   : > { %v2877_v28 = vadd.f32 %v2381_v25, %v446_v27 }
 0x139   : > { %2663 = dma.done.wait [#allocation3], 1024 }
 0x13a   : > { %2664 = vsyncadd [#allocation3], 4294966272  ;;  %v1734_v29 = vld [vmem:[#allocation2 + $0x70] sm:$0xf]  ;;  %v2193_v30 = vld [vmem:[#allocation2 + $0x74] sm:$0xf0]  ;;  %v487_v53 = vpack.c.bf16 %v2877_v28, %v2877_v28  ;;  %v553_v54 = vlaneseq }
 0x13b   : > { %v1730_v31 = vld [vmem:[#allocation2 + $0x60] sm:$0xf]  ;;  %v1735_v32 = vor.u32 %v2193_v30, %v1734_v29  ;;  %v2192_v33 = vld [vmem:[#allocation2 + $0x64] sm:$0xf0]  ;;  %v1726_v35 = vld [vmem:[#allocation2 + $0x50] sm:$0xf] }
 0x13c   : > { %v1731_v34 = vor.u32 %v2192_v33, %v1730_v31  ;;  %v2191_v36 = vld [vmem:[#allocation2 + $0x54] sm:$0xf0]  ;;  %v1722_v38 = vld [vmem:[#allocation2 + $0x40] sm:$0xf]  ;;  %v2190_v39 = vld [vmem:[#allocation2 + $0x44] sm:$0xf0] }
 0x13d   : > { %540 = vmatpush.bf16.msra.mxu0 %v1735_v32  ;;  %v1727_v37 = vor.u32 %v2191_v36, %v1726_v35  ;;  %v1723_v40 = vor.u32 %v2190_v39, %v1722_v38  ;;  %v1718_v41 = vld [vmem:[#allocation2 + $0x30] sm:$0xf]  ;;  %v2189_v42 = vld [vmem:[#allocation2 + $0x34] sm:$0xf0]  ;;  %v1714_v44 = vld [vmem:[#allocation2 + $0x20] sm:$0xf] }
 0x13e   : > { %v1719_v43 = vor.u32 %v2189_v42, %v1718_v41  ;;  %v2188_v45 = vld [vmem:[#allocation2 + $0x24] sm:$0xf0]  ;;  %v1710_v47 = vld [vmem:[#allocation2 + $0x10] sm:$0xf]  ;;  %v2187_v48 = vld [vmem:[#allocation2 + $0x14] sm:$0xf0] }
 0x13f   : > { %v1715_v46 = vor.u32 %v2188_v45, %v1714_v44  ;;  %v1711_v49 = vor.u32 %v2187_v48, %v1710_v47  ;;  %v1706_v50 = vld [vmem:[#allocation2] sm:$0xf]  ;;  %v2186_v51 = vld [vmem:[#allocation2 + $0x4] sm:$0xf0]  ;;  %s481_s21 = sshll.u32 %s3029_s9, 4  ;;  %s2703_s22 = smov [#allocation2 + $0x180]   ;;  %s482_s21 = int_to_ptr.hbm [resolvable:$true] %s481_s21 }
 0x140   : > { %v1707_v52 = vor.u32 %v2186_v51, %v1706_v50  ;;  %s2888_s24 = sshll.u32 %s2703_s22, 4  ;;  %v2893_v55 = vshrl.u32 %v553_v54, 7  ;;  %v2386_v57 = vld [vmem:[#allocation9] ss:$0 sm:$0xff]  ;;  %s484_s24 = int_to_ptr.vmem [resolvable:$true] %s2888_s24 }
 0x141   : > { %541 = vmatpush.bf16.msra.mxu0 %v1731_v34  ;;  %486 = dma.hbm_to_vmem [thread:$0]  %s482_s21, 6144, %s484_s24, [#allocation3 + $0x1] }
 0x142   : > { %v559_v56 = vand.u32 7, %v2893_v55 }
 0x145   : > { %542 = vmatpush.bf16.msra.mxu0 %v1727_v37 }
 0x149   : > { %543 = vmatpush.bf16.msra.mxu0 %v1723_v40 }
 0x14d   : > { %544 = vmatpush.bf16.msra.mxu0 %v1719_v43 }
 0x151   : > { %545 = vmatpush.bf16.msra.mxu0 %v1715_v46 }
 0x155   : > { %546 = vmatpush.bf16.msra.mxu0 %v1711_v49 }
 0x159   : > { %547 = vmatpush.bf16.msra.mxu0 %v1707_v52 }
 0x15c   : > { %548 = vmatmul.bf16.vlgmr.msra.gmra.mxu0 %v487_v53 }
 0x1d9   : > { %v549_v58 = vpop.f32.mrf.mxu0 }
 0x1da   : > { %v2896_v59 = vadd.f32 %v2386_v57, %v549_v58 }
 0x1e1   : > { %v551_v60 = vpop.f32.mrf.mxu0 }
 0x1e2   : > { %2665 = dma.done.wait [#allocation3 + $0x1], 6144 }
 0x1e3   : > { %2666 = vsyncadd [#allocation3 + $0x1], 4294961152  ;;  %v2704_v61 = vmov 0   ;;  %v1858_v62 = vld [vmem:[#allocation2 + $0x270] sm:$0xf]  ;;  %s626_s16 = sshll.u32 %s3030_s10, 4  ;;  %s627_s16 = int_to_ptr.hbm [resolvable:$true] %s626_s16 }
 0x1e4   : > { %2387 = vset.pattern.permute.xlu0 %v2704_v61  ;;  %v2225_v63 = vld [vmem:[#allocation2 + $0x274] sm:$0xf0]  ;;  %v1794_v0 = vld [vmem:[#allocation2 + $0x1f0] sm:$0xf]  ;;  %v1850_v5 = vld [vmem:[#allocation2 + $0x260] sm:$0xf] }
 0x1e5   : > { %634 = vperm.xlu0 %2387, %v414_v2   ;;  %v1859_v3 = vor.u32 %v2225_v63, %v1858_v62  ;;  %v2209_v4 = vld [vmem:[#allocation2 + $0x1f4] sm:$0xf0]  ;;  %v2223_v6 = vld [vmem:[#allocation2 + $0x264] sm:$0xf0]  ;;  %v1786_v8 = vld [vmem:[#allocation2 + $0x1e0] sm:$0xf] }
 0x1e6   : > { %v1795_v7 = vor.u32 %v2209_v4, %v1794_v0  ;;  %v2207_v9 = vld [vmem:[#allocation2 + $0x1e4] sm:$0xf0]  ;;  %v1851_v10 = vor.u32 %v2223_v6, %v1850_v5  ;;  %v1842_v12 = vld [vmem:[#allocation2 + $0x250] sm:$0xf]  ;;  %v2221_v13 = vld [vmem:[#allocation2 + $0x254] sm:$0xf0] }
 0x1e7   : > { %922 = vmatpush.bf16.msra.mxu2 %v1859_v3  ;;  %v1787_v11 = vor.u32 %v2207_v9, %v1786_v8  ;;  %v1778_v14 = vld [vmem:[#allocation2 + $0x1d0] sm:$0xf]  ;;  %v2205_v15 = vld [vmem:[#allocation2 + $0x1d4] sm:$0xf0]  ;;  %v2208_v17 = vld [vmem:[#allocation2 + $0x1f4] sm:$0xf]  ;;  %v1843_v19 = vor.u32 %v2221_v13, %v1842_v12 }
 0x1e8   : > { %909 = vmatpush.bf16.msra.mxu1 %v1795_v7  ;;  %v1922_v1 = vld [vmem:[#allocation2 + $0x2f0] sm:$0xf]  ;;  %v2241_v2 = vld [vmem:[#allocation2 + $0x2f4] sm:$0xf0]  ;;  %v1796_v18 = vld [vmem:[#allocation2 + $0x1f8] sm:$0xf0]  ;;  %v1779_v23 = vor.u32 %v2205_v15, %v1778_v14 }
 0x1e9   : > { %v1923_v16 = vor.u32 %v2241_v2, %v1922_v1  ;;  %v1834_v20 = vld [vmem:[#allocation2 + $0x240] sm:$0xf]  ;;  %v2219_v21 = vld [vmem:[#allocation2 + $0x244] sm:$0xf0]  ;;  %v1799_v22 = vor.u32 %v2208_v17, %v1796_v18  ;;  %v2206_v26 = vld [vmem:[#allocation2 + $0x1e4] sm:$0xf] }
 0x1ea   : > { %v1914_v24 = vld [vmem:[#allocation2 + $0x2e0] sm:$0xf]  ;;  %v2239_v25 = vld [vmem:[#allocation2 + $0x2e4] sm:$0xf0]  ;;  %v1788_v31 = vld [vmem:[#allocation2 + $0x1e8] sm:$0xf0]  ;;  %v1835_v34 = vor.u32 %v2219_v21, %v1834_v20 }
 0x1eb   : > { %923 = vmatpush.bf16.msra.mxu2 %v1851_v10  ;;  %935 = vmatpush.bf16.msra.mxu3 %v1923_v16  ;;  %v1770_v27 = vld [vmem:[#allocation2 + $0x1c0] sm:$0xf]  ;;  %v2203_v29 = vld [vmem:[#allocation2 + $0x1c4] sm:$0xf0]  ;;  %v1915_v30 = vor.u32 %v2239_v25, %v1914_v24  ;;  %v1791_v32 = vor.u32 %v2206_v26, %v1788_v31  ;;  %v1906_v33 = vld [vmem:[#allocation2 + $0x2d0] sm:$0xf] }
 0x1ec   : > { %910 = vmatpush.bf16.msra.mxu1 %v1787_v11  ;;  %948 = vmatpush.bf16.msrb.mxu0 %v1799_v22  ;;  %v2237_v35 = vld [vmem:[#allocation2 + $0x2d4] sm:$0xf0]  ;;  %v2204_v36 = vld [vmem:[#allocation2 + $0x1d4] sm:$0xf]  ;;  %v1780_v37 = vld [vmem:[#allocation2 + $0x1d8] sm:$0xf0]  ;;  %v1771_v38 = vor.u32 %v2203_v29, %v1770_v27 }
 0x1ed   : > { %v1826_v39 = vld [vmem:[#allocation2 + $0x230] sm:$0xf]  ;;  %v2217_v40 = vld [vmem:[#allocation2 + $0x234] sm:$0xf0]  ;;  %v1907_v42 = vor.u32 %v2237_v35, %v1906_v33  ;;  %v1783_v44 = vor.u32 %v2204_v36, %v1780_v37  ;;  %v1898_v45 = vld [vmem:[#allocation2 + $0x2c0] sm:$0xf] }
 0x1ee   : > { %v1762_v41 = vld [vmem:[#allocation2 + $0x1b0] sm:$0xf]  ;;  %v2201_v43 = vld [vmem:[#allocation2 + $0x1b4] sm:$0xf0]  ;;  %v2235_v46 = vld [vmem:[#allocation2 + $0x2c4] sm:$0xf0]  ;;  %v1827_v49 = vor.u32 %v2217_v40, %v1826_v39 }
 0x1ef   : > { %924 = vmatpush.bf16.msra.mxu2 %v1843_v19  ;;  %936 = vmatpush.bf16.msra.mxu3 %v1915_v30  ;;  %v2202_v47 = vld [vmem:[#allocation2 + $0x1c4] sm:$0xf]  ;;  %v1772_v48 = vld [vmem:[#allocation2 + $0x1c8] sm:$0xf0]  ;;  %v1763_v50 = vor.u32 %v2201_v43, %v1762_v41  ;;  %v1818_v51 = vld [vmem:[#allocation2 + $0x220] sm:$0xf]  ;;  %v1899_v54 = vor.u32 %v2235_v46, %v1898_v45 }
 0x1f0   : > { %911 = vmatpush.bf16.msra.mxu1 %v1779_v23  ;;  %949 = vmatpush.bf16.msrb.mxu0 %v1791_v32  ;;  %v2215_v52 = vld [vmem:[#allocation2 + $0x224] sm:$0xf0]  ;;  %v1754_v53 = vld [vmem:[#allocation2 + $0x1a0] sm:$0xf]  ;;  %v1775_v58 = vor.u32 %v2202_v47, %v1772_v48  ;;  %v1890_v60 = vld [vmem:[#allocation2 + $0x2b0] sm:$0xf] }
 0x1f1   : > { %v2199_v57 = vld [vmem:[#allocation2 + $0x1a4] sm:$0xf0]  ;;  %v2233_v61 = vld [vmem:[#allocation2 + $0x2b4] sm:$0xf0]  ;;  %v2200_v62 = vld [vmem:[#allocation2 + $0x1b4] sm:$0xf]  ;;  %v1819_v0 = vor.u32 %v2215_v52, %v1818_v51 }
 0x1f2   : > { %v1764_v63 = vld [vmem:[#allocation2 + $0x1b8] sm:$0xf0]  ;;  %v1755_v3 = vor.u32 %v2199_v57, %v1754_v53  ;;  %v1810_v4 = vld [vmem:[#allocation2 + $0x210] sm:$0xf]  ;;  %v2213_v5 = vld [vmem:[#allocation2 + $0x214] sm:$0xf0]  ;;  %v1891_v7 = vor.u32 %v2233_v61, %v1890_v60 }
 0x1f3   : > { %925 = vmatpush.bf16.msra.mxu2 %v1835_v34  ;;  %937 = vmatpush.bf16.msra.mxu3 %v1907_v42  ;;  %v1746_v6 = vld [vmem:[#allocation2 + $0x190] sm:$0xf]  ;;  %v2197_v8 = vld [vmem:[#allocation2 + $0x194] sm:$0xf0]  ;;  %v1767_v9 = vor.u32 %v2200_v62, %v1764_v63  ;;  %v1882_v10 = vld [vmem:[#allocation2 + $0x2a0] sm:$0xf]  ;;  %v1811_v14 = vor.u32 %v2213_v5, %v1810_v4 }
 0x1f4   : > { %912 = vmatpush.bf16.msra.mxu1 %v1771_v38  ;;  %950 = vmatpush.bf16.msrb.mxu0 %v1783_v44  ;;  %v2231_v11 = vld [vmem:[#allocation2 + $0x2a4] sm:$0xf0]  ;;  %v2198_v12 = vld [vmem:[#allocation2 + $0x1a4] sm:$0xf]  ;;  %v1756_v13 = vld [vmem:[#allocation2 + $0x1a8] sm:$0xf0]  ;;  %v1747_v15 = vor.u32 %v2197_v8, %v1746_v6 }
 0x1f5   : > { %v1802_v1 = vld [vmem:[#allocation2 + $0x200] sm:$0xf]  ;;  %v2211_v2 = vld [vmem:[#allocation2 + $0x204] sm:$0xf0]  ;;  %v2240_v16 = vld [vmem:[#allocation2 + $0x2f4] sm:$0xf]  ;;  %v1883_v17 = vor.u32 %v2231_v11, %v1882_v10  ;;  %v1759_v21 = vor.u32 %v2198_v12, %v1756_v13 }
 0x1f6   : > { %v1924_v18 = vld [vmem:[#allocation2 + $0x2f8] sm:$0xf0]  ;;  %v1738_v19 = vld [vmem:[#allocation2 + $0x180] sm:$0xf]  ;;  %v2195_v20 = vld [vmem:[#allocation2 + $0x184] sm:$0xf0]  ;;  %v1803_v24 = vor.u32 %v2211_v2, %v1802_v1 }
 0x1f7   : > { %926 = vmatpush.bf16.msra.mxu2 %v1827_v49  ;;  %938 = vmatpush.bf16.msra.mxu3 %v1899_v54  ;;  %v2224_v22 = vld [vmem:[#allocation2 + $0x274] sm:$0xf]  ;;  %v1860_v23 = vld [vmem:[#allocation2 + $0x278] sm:$0xf0]  ;;  %v1927_v25 = vor.u32 %v2240_v16, %v1924_v18  ;;  %v1739_v26 = vor.u32 %v2195_v20, %v1738_v19  ;;  %v2238_v29 = vld [vmem:[#allocation2 + $0x2e4] sm:$0xf] }
 0x1f8   : > { %913 = vmatpush.bf16.msra.mxu1 %v1763_v50  ;;  %951 = vmatpush.bf16.msrb.mxu0 %v1775_v58  ;;  %v1863_v27 = vor.u32 %v2224_v22, %v1860_v23  ;;  %v1916_v30 = vld [vmem:[#allocation2 + $0x2e8] sm:$0xf0]  ;;  %v2222_v31 = vld [vmem:[#allocation2 + $0x264] sm:$0xf]  ;;  %v2236_v35 = vld [vmem:[#allocation2 + $0x2d4] sm:$0xf] }
 0x1f9   : > { %v1852_v32 = vld [vmem:[#allocation2 + $0x268] sm:$0xf0]  ;;  %v1919_v33 = vor.u32 %v2238_v29, %v1916_v30  ;;  %v1908_v36 = vld [vmem:[#allocation2 + $0x2d8] sm:$0xf0]  ;;  %v1874_v38 = vld [vmem:[#allocation2 + $0x290] sm:$0xf] }
 0x1fa   : > { %v1855_v34 = vor.u32 %v2222_v31, %v1852_v32  ;;  %v1911_v37 = vor.u32 %v2236_v35, %v1908_v36  ;;  %v2229_v39 = vld [vmem:[#allocation2 + $0x294] sm:$0xf0]  ;;  %v2196_v40 = vld [vmem:[#allocation2 + $0x194] sm:$0xf]  ;;  %v1748_v42 = vld [vmem:[#allocation2 + $0x198] sm:$0xf0] }
 0x1fb   : > { %927 = vmatpush.bf16.msra.mxu2 %v1819_v0  ;;  %939 = vmatpush.bf16.msra.mxu3 %v1891_v7  ;;  %v1875_v41 = vor.u32 %v2229_v39, %v1874_v38  ;;  %v2220_v43 = vld [vmem:[#allocation2 + $0x254] sm:$0xf]  ;;  %v1844_v44 = vld [vmem:[#allocation2 + $0x258] sm:$0xf0]  ;;  %v1751_v45 = vor.u32 %v2196_v40, %v1748_v42  ;;  %v2234_v47 = vld [vmem:[#allocation2 + $0x2c4] sm:$0xf] }
 0x1fc   : > { %914 = vmatpush.bf16.msra.mxu1 %v1755_v3  ;;  %952 = vmatpush.bf16.msrb.mxu0 %v1767_v9  ;;  %v1847_v46 = vor.u32 %v2220_v43, %v1844_v44  ;;  %v1900_v48 = vld [vmem:[#allocation2 + $0x2c8] sm:$0xf0]  ;;  %v1866_v50 = vld [vmem:[#allocation2 + $0x280] sm:$0xf]  ;;  %v2227_v51 = vld [vmem:[#allocation2 + $0x284] sm:$0xf0] }
 0x1fd   : > { %v1903_v49 = vor.u32 %v2234_v47, %v1900_v48  ;;  %v2194_v52 = vld [vmem:[#allocation2 + $0x184] sm:$0xf]  ;;  %v1867_v53 = vor.u32 %v2227_v51, %v1866_v50  ;;  %v1740_v54 = vld [vmem:[#allocation2 + $0x188] sm:$0xf0]  ;;  %v2232_v62 = vld [vmem:[#allocation2 + $0x2b4] sm:$0xf] }
 0x1fe   : > { %v2218_v57 = vld [vmem:[#allocation2 + $0x244] sm:$0xf]  ;;  %v1836_v58 = vld [vmem:[#allocation2 + $0x248] sm:$0xf0]  ;;  %v1743_v60 = vor.u32 %v2194_v52, %v1740_v54  ;;  %v1892_v63 = vld [vmem:[#allocation2 + $0x2b8] sm:$0xf0] }
 0x1ff   : > { %928 = vmatpush.bf16.msra.mxu2 %v1811_v14  ;;  %940 = vmatpush.bf16.msra.mxu3 %v1883_v17  ;;  %v1839_v61 = vor.u32 %v2218_v57, %v1836_v58  ;;  %v1895_v0 = vor.u32 %v2232_v62, %v1892_v63  ;;  %v2216_v3 = vld [vmem:[#allocation2 + $0x234] sm:$0xf]  ;;  %v1828_v4 = vld [vmem:[#allocation2 + $0x238] sm:$0xf0]  ;;  %v2230_v6 = vld [vmem:[#allocation2 + $0x2a4] sm:$0xf] }
 0x200   : > { %915 = vmatpush.bf16.msra.mxu1 %v1747_v15  ;;  %953 = vmatpush.bf16.msrb.mxu0 %v1759_v21  ;;  %v1831_v5 = vor.u32 %v2216_v3, %v1828_v4  ;;  %v1884_v7 = vld [vmem:[#allocation2 + $0x2a8] sm:$0xf0]  ;;  %v2214_v8 = vld [vmem:[#allocation2 + $0x224] sm:$0xf]  ;;  %v2228_v11 = vld [vmem:[#allocation2 + $0x294] sm:$0xf] }
 0x201   : > { %v1887_v9 = vor.u32 %v2230_v6, %v1884_v7  ;;  %v1820_v10 = vld [vmem:[#allocation2 + $0x228] sm:$0xf0]  ;;  %v1876_v12 = vld [vmem:[#allocation2 + $0x298] sm:$0xf0]  ;;  %v2212_v14 = vld [vmem:[#allocation2 + $0x214] sm:$0xf] }
 0x202   : > { %v1823_v13 = vor.u32 %v2214_v8, %v1820_v10  ;;  %v1812_v15 = vld [vmem:[#allocation2 + $0x218] sm:$0xf0]  ;;  %v1879_v1 = vor.u32 %v2228_v11, %v1876_v12  ;;  %v2226_v2 = vld [vmem:[#allocation2 + $0x284] sm:$0xf]  ;;  %v1868_v16 = vld [vmem:[#allocation2 + $0x288] sm:$0xf0] }
 0x203   : > { %929 = vmatpush.bf16.msra.mxu2 %v1803_v24  ;;  %941 = vmatpush.bf16.msra.mxu3 %v1875_v41  ;;  %v1815_v17 = vor.u32 %v2212_v14, %v1812_v15  ;;  %v2210_v18 = vld [vmem:[#allocation2 + $0x204] sm:$0xf]  ;;  %v1804_v19 = vld [vmem:[#allocation2 + $0x208] sm:$0xf0]  ;;  %v1871_v20 = vor.u32 %v2226_v2, %v1868_v16  ;;  %v639_v22 = vadd.s32 4294967295, %v559_v56  ;;  %v655_v23 = vadd.s32 1, %v559_v56 }
 0x204   : > { %916 = vmatpush.bf16.msra.mxu1 %v1739_v26  ;;  %954 = vmatpush.bf16.msrb.mxu0 %v1751_v45  ;;  %v1807_v21 = vor.u32 %v2210_v18, %v1804_v19  ;;  %631 = dma.hbm_to_vmem [thread:$0]  %s627_s16, 6144, %s407_s27, [#allocation3] }
 0x205   : > { %vm640_vm4 = vcmp.ge.s32.totalorder %v639_v22, 0  ;;  %vm657_vm5 = vcmp.lt.s32.totalorder %v655_v23, 8 }
 0x206   : > { %vm2908_vm6 = vmpackc.low %vm640_vm4, %vm640_vm4 }
 0x207   : > { %974 = vmatpush.bf16.msrb.mxu2 %v1927_v25  ;;  %942 = vmatpush.bf16.msra.mxu3 %v1867_v53  ;;  %vm2912_vm7 = vmpackc.low %vm657_vm5, %vm657_vm5 }
 0x208   : > { %961 = vmatpush.bf16.msrb.mxu1 %v1863_v27  ;;  %955 = vmatpush.bf16.msrb.mxu0 %v1743_v60 }
 0x20b   : > { %975 = vmatpush.bf16.msrb.mxu2 %v1919_v33 }
 0x20c   : > { %962 = vmatpush.bf16.msrb.mxu1 %v1855_v34 }
 0x20f   : > { %976 = vmatpush.bf16.msrb.mxu2 %v1911_v37  ;;  %v663_v37 = vld [vmem:[%s3026_s6] sm:$0x3] }
 0x210   : > { %963 = vmatpush.bf16.msrb.mxu1 %v1847_v46  ;;  %v666_v39 = vperm.slane %v663_v37, 1  ;;  %v665_v51 = vperm.slane %v663_v37, 0 }
 0x213   : > { %977 = vmatpush.bf16.msrb.mxu2 %v1903_v49 }
 0x214   : > { %964 = vmatpush.bf16.msrb.mxu1 %v1839_v61 }
 0x217   : > { %978 = vmatpush.bf16.msrb.mxu2 %v1895_v0 }
 0x218   : > { %965 = vmatpush.bf16.msrb.mxu1 %v1831_v5 }
 0x21b   : > { %979 = vmatpush.bf16.msrb.mxu2 %v1887_v9 }
 0x21c   : > { %966 = vmatpush.bf16.msrb.mxu1 %v1823_v13 }
 0x21f   : > { %980 = vmatpush.bf16.msrb.mxu2 %v1879_v1 }
 0x220   : > { %967 = vmatpush.bf16.msrb.mxu1 %v1815_v17 }
 0x223   : > { %981 = vmatpush.bf16.msrb.mxu2 %v1871_v20 }
 0x224   : > { %968 = vmatpush.bf16.msrb.mxu1 %v1807_v21 }
 0x257   : > { %v2904_v24 = vpop.permute.xlu0 %634 }
 0x258   : > { %v637_v25 = vmul.f32 %v2904_v24, %v2896_v59 }
 0x25a   : > { %v638_v26 = vrot.slane %v637_v25, 7  ;;  %v654_v27 = vrot.slane %v637_v25, 1  ;;  %v653_v29 = vpack.c.bf16 %v637_v25, %v637_v25 }
 0x25c   : > { %930 = vmatmul.bf16.vlgmr.msra.gmra.mxu2 %v653_v29  ;;  %v1929_v55 = vpack.c.bf16 %v638_v26, %v638_v26  ;;  %v1932_v56 = vpack.c.bf16 %v654_v27, %v654_v27 }
 0x25e   : > { %1930 = vmatmul.msk.bf16.vlgmr.msra.gmra.mxu1 %vm2908_vm6, %v1929_v55  ;;  %1933 = vmatmul.msk.bf16.vlgmr.msra.gmra.mxu3 %vm2912_vm7, %v1932_v56 }
 0x25f   : > { %1936 = vmatmul.msk.bf16.vlgmr.msrb.gmra.mxu0 %vm2908_vm6, %v1929_v55 }
 0x26c   : > { %1939 = vmatmul.msk.bf16.vlgmr.msrb.gmra.mxu2 %vm2912_vm7, %v1932_v56 }
 0x26e   : > { %969 = vmatmul.bf16.vlgmr.msrb.gmra.mxu1 %v653_v29 }
 0x2db   : > { %v918_v59 = vpop.f32.mrf.mxu1 }
 0x2dc   : > { %v957_v32 = vpop.f32.mrf.mxu0  ;;  %v919_v54 = vadd.f32 %v918_v59, %v665_v51 }
 0x2dd   : > { %v958_v42 = vadd.f32 %v957_v32, %v666_v39 }
 0x2df   : > { %v931_v33 = vpop.f32.mrf.mxu2 }
 0x2e0   : > { %v932_v60 = vadd.f32 %v931_v33, %v919_v54 }
 0x2e1   : > { %v944_v34 = vpop.f32.mrf.mxu3 }
 0x2e2   : > { %v945_v3 = vadd.f32 %v944_v34, %v932_v60 }
 0x2e3   : > { %v920_v35 = vpop.f32.mrf.mxu1 }
 0x2e4   : > { %v959_v36 = vpop.f32.mrf.mxu0 }
 0x2e7   : > { %v933_v38 = vpop.f32.mrf.mxu2 }
 0x2e9   : > { %v946_v40 = vpop.f32.mrf.mxu3 }
 0x2eb   : > { %v970_v41 = vpop.f32.mrf.mxu1 }
 0x2ec   : > { %v971_v43 = vadd.f32 %v970_v41, %v958_v42 }
 0x2ef   : > { %v983_v44 = vpop.f32.mrf.mxu2 }
 0x2f0   : > { %v984_v45 = vadd.f32 %v983_v44, %v971_v43 }
 0x2f2   : > { %v1940_v46 = vmul.f32 -1.442695, %v984_v45 }
 0x2f3   : > { %v972_v47 = vpop.f32.mrf.mxu1 }
 0x2f4   : > { %2388 = vpow2.f32 %v1940_v46 }
 0x2f7   : > { %v985_v48 = vpop.f32.mrf.mxu2 }
 0x2fa   : > { %v2389_v49 = vpop.eup %2388 }
 0x2fb   : > { %v990_v50 = vadd.f32 1.0, %v2389_v49 }
 0x2fd   : > { %2390 = vrcp.f32 %v990_v50  ;;  %v1002_v58 = vand.u32 2147483648, %v990_v50  ;;  %v1000_v62 = vand.u32 2147483647, %v990_v50  ;;  %vm996_vm9 = vweird.f32 %v990_v50 }
 0x2ff   : > { %v1003_v0 = vor.u32 1.1754944e-38, %v1002_v58  ;;  %vm1001_vm11 = vcmp.eq.f32.partialorder %v1000_v62, 8.507059e+37 }
 0x303   : > { %v2391_v52 = vpop.eup %2390 }
 0x304   : > { %v992_v53 = vmul.f32 %v2391_v52, %v990_v50  ;;  %vm997_vm8 = vweird.f32 %v2391_v52 }
 0x305   : > { %vm998_vm10 = vmor %vm996_vm9, %vm997_vm8 }
 0x306   : > { %v993_v57 = vsub.f32 1.0, %v992_v53 }
 0x308   : > { %v994_v61 = vmul.f32 %v2391_v52, %v993_v57 }
 0x30a   : > { %v995_v63 = vadd.f32 %v2391_v52, %v994_v61 }
 0x30c   : > { %v999_v4 = vsel %vm998_vm10, %v2391_v52, %v995_v63 }
 0x30d   : > { %v1004_v5 = vsel %vm1001_vm11, %v1003_v0, %v999_v4 }
 0x30e   : > { %v2932_v6 = vmul.f32 %v1004_v5, %v945_v3 }
 0x30f   : > { %2667 = dma.done.wait [#allocation3], 6144 }
 0x310   : > { %2668 = vsyncadd [#allocation3], 4294961152  ;;  %v1999_v7 = vld [vmem:[#allocation2 + $0x70] sm:$0xf]  ;;  %v2257_v8 = vld [vmem:[#allocation2 + $0x74] sm:$0xf0] }
 0x311   : > { %v2063_v9 = vld [vmem:[#allocation2 + $0xf0] sm:$0xf]  ;;  %v2000_v10 = vor.u32 %v2257_v8, %v1999_v7  ;;  %v2273_v11 = vld [vmem:[#allocation2 + $0xf4] sm:$0xf0]  ;;  %v1991_v12 = vld [vmem:[#allocation2 + $0x60] sm:$0xf] }
 0x312   : > { %v2255_v13 = vld [vmem:[#allocation2 + $0x64] sm:$0xf0]  ;;  %v2064_v14 = vor.u32 %v2273_v11, %v2063_v9  ;;  %v2055_v15 = vld [vmem:[#allocation2 + $0xe0] sm:$0xf]  ;;  %v1983_v17 = vld [vmem:[#allocation2 + $0x50] sm:$0xf] }
 0x313   : > { %v2271_v1 = vld [vmem:[#allocation2 + $0xe4] sm:$0xf0]  ;;  %1320 = vmatpush.bf16.msrb.mxu3 %v2000_v10  ;;  %v1992_v2 = vor.u32 %v2255_v13, %v1991_v12  ;;  %v2253_v18 = vld [vmem:[#allocation2 + $0x54] sm:$0xf0]  ;;  %v2047_v19 = vld [vmem:[#allocation2 + $0xd0] sm:$0xf] }
 0x314   : > { %1333 = vmatpush.bf16.msra.mxu0 %v2064_v14  ;;  %v2056_v16 = vor.u32 %v2271_v1, %v2055_v15  ;;  %v2269_v20 = vld [vmem:[#allocation2 + $0xd4] sm:$0xf0]  ;;  %v2256_v21 = vld [vmem:[#allocation2 + $0x74] sm:$0xf]  ;;  %v1984_v22 = vor.u32 %v2253_v18, %v1983_v17  ;;  %v1975_v23 = vld [vmem:[#allocation2 + $0x40] sm:$0xf] }
 0x315   : > { %v2251_v25 = vld [vmem:[#allocation2 + $0x44] sm:$0xf0]  ;;  %v2001_v26 = vld [vmem:[#allocation2 + $0x78] sm:$0xf0]  ;;  %v2048_v27 = vor.u32 %v2269_v20, %v2047_v19  ;;  %v2039_v29 = vld [vmem:[#allocation2 + $0xc0] sm:$0xf] }
 0x316   : > { %v2267_v55 = vld [vmem:[#allocation2 + $0xc4] sm:$0xf0]  ;;  %v2004_v56 = vor.u32 %v2256_v21, %v2001_v26  ;;  %v2127_v59 = vld [vmem:[#allocation2 + $0x170] sm:$0xf]  ;;  %v2289_v32 = vld [vmem:[#allocation2 + $0x174] sm:$0xf0]  ;;  %v1976_v37 = vor.u32 %v2251_v25, %v1975_v23 }
 0x317   : > { %1321 = vmatpush.bf16.msrb.mxu3 %v1992_v2  ;;  %v2254_v33 = vld [vmem:[#allocation2 + $0x64] sm:$0xf]  ;;  %v1993_v34 = vld [vmem:[#allocation2 + $0x68] sm:$0xf0]  ;;  %v2128_v35 = vor.u32 %v2289_v32, %v2127_v59  ;;  %v1967_v38 = vld [vmem:[#allocation2 + $0x30] sm:$0xf]  ;;  %v2040_v41 = vor.u32 %v2267_v55, %v2039_v29 }
 0x318   : > { %1334 = vmatpush.bf16.msra.mxu0 %v2056_v16  ;;  %1359 = vmatpush.bf16.msra.mxu2 %v2004_v56  ;;  %v1996_v36 = vor.u32 %v2254_v33, %v1993_v34  ;;  %v2119_v39 = vld [vmem:[#allocation2 + $0x160] sm:$0xf]  ;;  %v2287_v40 = vld [vmem:[#allocation2 + $0x164] sm:$0xf0]  ;;  %v2249_v42 = vld [vmem:[#allocation2 + $0x34] sm:$0xf0]  ;;  %v2936_v16 = vmul.f32 %v2932_v6, %v2904_v24 }
 0x319   : > { %1346 = vmatpush.bf16.msra.mxu1 %v2128_v35  ;;  %v2120_v43 = vor.u32 %v2287_v40, %v2119_v39  ;;  %v2252_v44 = vld [vmem:[#allocation2 + $0x54] sm:$0xf]  ;;  %v1985_v45 = vld [vmem:[#allocation2 + $0x58] sm:$0xf0]  ;;  %v2031_v46 = vld [vmem:[#allocation2 + $0xb0] sm:$0xf]  ;;  %v1968_v49 = vor.u32 %v2249_v42, %v1967_v38 }
 0x31a   : > { %v2265_v47 = vld [vmem:[#allocation2 + $0xb4] sm:$0xf0]  ;;  %v1988_v48 = vor.u32 %v2252_v44, %v1985_v45  ;;  %v1959_v50 = vld [vmem:[#allocation2 + $0x20] sm:$0xf]  ;;  %v2111_v51 = vld [vmem:[#allocation2 + $0x150] sm:$0xf] }
 0x31b   : > { %1322 = vmatpush.bf16.msrb.mxu3 %v1984_v22  ;;  %v2285_v52 = vld [vmem:[#allocation2 + $0x154] sm:$0xf0]  ;;  %v2032_v53 = vor.u32 %v2265_v47, %v2031_v46  ;;  %v2247_v54 = vld [vmem:[#allocation2 + $0x24] sm:$0xf0]  ;;  %v2250_v58 = vld [vmem:[#allocation2 + $0x44] sm:$0xf] }
 0x31c   : > { %1335 = vmatpush.bf16.msra.mxu0 %v2048_v27  ;;  %1360 = vmatpush.bf16.msra.mxu2 %v1996_v36  ;;  %v2112_v57 = vor.u32 %v2285_v52, %v2111_v51  ;;  %v1977_v60 = vld [vmem:[#allocation2 + $0x48] sm:$0xf0]  ;;  %v2023_v61 = vld [vmem:[#allocation2 + $0xa0] sm:$0xf]  ;;  %v2263_v62 = vld [vmem:[#allocation2 + $0xa4] sm:$0xf0]  ;;  %v1960_v4 = vor.u32 %v2247_v54, %v1959_v50 }
 0x31d   : > { %1347 = vmatpush.bf16.msra.mxu1 %v2120_v43  ;;  %v1980_v63 = vor.u32 %v2250_v58, %v1977_v60  ;;  %v2103_v0 = vld [vmem:[#allocation2 + $0x140] sm:$0xf]  ;;  %v2283_v3 = vld [vmem:[#allocation2 + $0x144] sm:$0xf0]  ;;  %v2248_v5 = vld [vmem:[#allocation2 + $0x34] sm:$0xf]  ;;  %v2024_v8 = vor.u32 %v2263_v62, %v2023_v61 }
 0x31e   : > { %v1969_v7 = vld [vmem:[#allocation2 + $0x38] sm:$0xf0]  ;;  %v1951_v9 = vld [vmem:[#allocation2 + $0x10] sm:$0xf]  ;;  %v2245_v10 = vld [vmem:[#allocation2 + $0x14] sm:$0xf0]  ;;  %v2104_v12 = vor.u32 %v2283_v3, %v2103_v0 }
 0x31f   : > { %1323 = vmatpush.bf16.msrb.mxu3 %v1976_v37  ;;  %v2015_v11 = vld [vmem:[#allocation2 + $0x90] sm:$0xf]  ;;  %v2261_v13 = vld [vmem:[#allocation2 + $0x94] sm:$0xf0]  ;;  %v1943_v1 = vld [vmem:[#allocation2] sm:$0xf]  ;;  %v1972_v2 = vor.u32 %v2248_v5, %v1969_v7  ;;  %v1952_v17 = vor.u32 %v2245_v10, %v1951_v9 }
 0x320   : > { %1336 = vmatpush.bf16.msra.mxu0 %v2040_v41  ;;  %1361 = vmatpush.bf16.msra.mxu2 %v1988_v48  ;;  %v2095_v14 = vld [vmem:[#allocation2 + $0x130] sm:$0xf]  ;;  %v2281_v15 = vld [vmem:[#allocation2 + $0x134] sm:$0xf0]  ;;  %v2243_v18 = vld [vmem:[#allocation2 + $0x4] sm:$0xf0]  ;;  %v2016_v21 = vor.u32 %v2261_v13, %v2015_v11  ;;  %v2941_v48 = vpack.c.bf16 %v2936_v16, %v2936_v16 }
 0x321   : > { %1348 = vmatpush.bf16.msra.mxu1 %v2112_v57  ;;  %v2246_v19 = vld [vmem:[#allocation2 + $0x24] sm:$0xf]  ;;  %v1961_v20 = vld [vmem:[#allocation2 + $0x28] sm:$0xf0]  ;;  %v2007_v22 = vld [vmem:[#allocation2 + $0x80] sm:$0xf]  ;;  %v2096_v26 = vor.u32 %v2281_v15, %v2095_v14  ;;  %v1944_v33 = vor.u32 %v2243_v18, %v1943_v1 }
 0x322   : > { %v2259_v23 = vld [vmem:[#allocation2 + $0x84] sm:$0xf0]  ;;  %v2272_v25 = vld [vmem:[#allocation2 + $0xf4] sm:$0xf]  ;;  %v2065_v27 = vld [vmem:[#allocation2 + $0xf8] sm:$0xf0]  ;;  %v1964_v6 = vor.u32 %v2246_v19, %v1961_v20 }
 0x323   : > { %1324 = vmatpush.bf16.msrb.mxu3 %v1968_v49  ;;  %v2288_v29 = vld [vmem:[#allocation2 + $0x174] sm:$0xf]  ;;  %v2129_v55 = vld [vmem:[#allocation2 + $0x178] sm:$0xf0]  ;;  %v1066_v56 = vrot.slane %v2936_v16, 7  ;;  %v2008_v36 = vor.u32 %v2259_v23, %v2007_v22  ;;  %v2068_v37 = vor.u32 %v2272_v25, %v2065_v27  ;;  %v1071_v7 = vrot.slane %v2936_v16, 1 }
 0x324   : > { %1337 = vmatpush.bf16.msra.mxu0 %v2032_v53  ;;  %1362 = vmatpush.bf16.msra.mxu2 %v1980_v63  ;;  %v2087_v59 = vld [vmem:[#allocation2 + $0x120] sm:$0xf]  ;;  %v2279_v32 = vld [vmem:[#allocation2 + $0x124] sm:$0xf0]  ;;  %v2244_v34 = vld [vmem:[#allocation2 + $0x14] sm:$0xf]  ;;  %v2132_v38 = vor.u32 %v2288_v29, %v2129_v55 }
 0x325   : > { %1349 = vmatpush.bf16.msra.mxu1 %v2104_v12  ;;  %v1953_v35 = vld [vmem:[#allocation2 + $0x18] sm:$0xf0]  ;;  %v2270_v39 = vld [vmem:[#allocation2 + $0xe4] sm:$0xf]  ;;  %v2057_v40 = vld [vmem:[#allocation2 + $0xe8] sm:$0xf0]  ;;  %v2088_v42 = vor.u32 %v2279_v32, %v2087_v59  ;;  %v2134_v44 = vpack.c.bf16 %v1066_v56, %v1066_v56  ;;  %v2137_v15 = vpack.c.bf16 %v1071_v7, %v1071_v7 }
 0x326   : > { %v2286_v41 = vld [vmem:[#allocation2 + $0x164] sm:$0xf]  ;;  %v2121_v43 = vld [vmem:[#allocation2 + $0x168] sm:$0xf0]  ;;  %v1956_v45 = vor.u32 %v2244_v34, %v1953_v35  ;;  %v2079_v46 = vld [vmem:[#allocation2 + $0x110] sm:$0xf]  ;;  %v2060_v51 = vor.u32 %v2270_v39, %v2057_v40 }
 0x327   : > { %1325 = vmatpush.bf16.msrb.mxu3 %v1960_v4  ;;  %v2277_v47 = vld [vmem:[#allocation2 + $0x114] sm:$0xf0]  ;;  %v2242_v49 = vld [vmem:[#allocation2 + $0x4] sm:$0xf]  ;;  %v1945_v50 = vld [vmem:[#allocation2 + $0x8] sm:$0xf0]  ;;  %v2124_v52 = vor.u32 %v2286_v41, %v2121_v43 }
 0x328   : > { %1338 = vmatpush.bf16.msra.mxu0 %v2024_v8  ;;  %1363 = vmatpush.bf16.msra.mxu2 %v1972_v2  ;;  %v2268_v53 = vld [vmem:[#allocation2 + $0xd4] sm:$0xf]  ;;  %v2049_v54 = vld [vmem:[#allocation2 + $0xd8] sm:$0xf0]  ;;  %v2080_v57 = vor.u32 %v2277_v47, %v2079_v46  ;;  %v1948_v61 = vor.u32 %v2242_v49, %v1945_v50  ;;  %v2071_v62 = vld [vmem:[#allocation2 + $0x100] sm:$0xf] }
 0x329   : > { %1350 = vmatpush.bf16.msra.mxu1 %v2096_v26  ;;  %v2284_v58 = vld [vmem:[#allocation2 + $0x154] sm:$0xf]  ;;  %v2113_v60 = vld [vmem:[#allocation2 + $0x158] sm:$0xf0]  ;;  %v2275_v63 = vld [vmem:[#allocation2 + $0x104] sm:$0xf0]  ;;  %v2052_v0 = vor.u32 %v2268_v53, %v2049_v54 }
 0x32a   : > { %v2116_v3 = vor.u32 %v2284_v58, %v2113_v60  ;;  %v2266_v4 = vld [vmem:[#allocation2 + $0xc4] sm:$0xf]  ;;  %v2041_v5 = vld [vmem:[#allocation2 + $0xc8] sm:$0xf0]  ;;  %v2072_v10 = vor.u32 %v2275_v63, %v2071_v62  ;;  %v2264_v13 = vld [vmem:[#allocation2 + $0xb4] sm:$0xf] }
 0x32b   : > { %1326 = vmatpush.bf16.msrb.mxu3 %v1952_v17  ;;  %v2282_v8 = vld [vmem:[#allocation2 + $0x144] sm:$0xf]  ;;  %v2105_v9 = vld [vmem:[#allocation2 + $0x148] sm:$0xf0]  ;;  %v2044_v11 = vor.u32 %v2266_v4, %v2041_v5  ;;  %v2033_v14 = vld [vmem:[#allocation2 + $0xb8] sm:$0xf0] }
 0x32c   : > { %1339 = vmatpush.bf16.msra.mxu0 %v2016_v21  ;;  %1364 = vmatpush.bf16.msra.mxu2 %v1964_v6  ;;  %v2108_v12 = vor.u32 %v2282_v8, %v2105_v9  ;;  %v2280_v1 = vld [vmem:[#allocation2 + $0x134] sm:$0xf]  ;;  %v2097_v2 = vld [vmem:[#allocation2 + $0x138] sm:$0xf0]  ;;  %v2036_v17 = vor.u32 %v2264_v13, %v2033_v14  ;;  %v2262_v18 = vld [vmem:[#allocation2 + $0xa4] sm:$0xf] }
 0x32d   : > { %1351 = vmatpush.bf16.msra.mxu1 %v2088_v42  ;;  %v2100_v16 = vor.u32 %v2280_v1, %v2097_v2  ;;  %v2025_v19 = vld [vmem:[#allocation2 + $0xa8] sm:$0xf0]  ;;  %v2278_v20 = vld [vmem:[#allocation2 + $0x124] sm:$0xf]  ;;  %v2260_v23 = vld [vmem:[#allocation2 + $0x94] sm:$0xf] }
 0x32e   : > { %v2089_v21 = vld [vmem:[#allocation2 + $0x128] sm:$0xf0]  ;;  %v2028_v22 = vor.u32 %v2262_v18, %v2025_v19  ;;  %v2017_v25 = vld [vmem:[#allocation2 + $0x98] sm:$0xf0]  ;;  %v2276_v26 = vld [vmem:[#allocation2 + $0x114] sm:$0xf] }
 0x32f   : > { %1327 = vmatpush.bf16.msrb.mxu3 %v1944_v33  ;;  %v2092_v30 = vor.u32 %v2278_v20, %v2089_v21  ;;  %v2081_v27 = vld [vmem:[#allocation2 + $0x118] sm:$0xf0]  ;;  %v2020_v29 = vor.u32 %v2260_v23, %v2017_v25  ;;  %v2258_v56 = vld [vmem:[#allocation2 + $0x84] sm:$0xf]  ;;  %v2009_v6 = vld [vmem:[#allocation2 + $0x88] sm:$0xf0] }
 0x330   : > { %1340 = vmatpush.bf16.msra.mxu0 %v2008_v36  ;;  %1365 = vmatpush.bf16.msra.mxu2 %v1956_v45  ;;  %v2084_v55 = vor.u32 %v2276_v26, %v2081_v27  ;;  %v2274_v59 = vld [vmem:[#allocation2 + $0x104] sm:$0xf]  ;;  %v2073_v32 = vld [vmem:[#allocation2 + $0x108] sm:$0xf0]  ;;  %v2012_v33 = vor.u32 %v2258_v56, %v2009_v6  ;;  %s1057_s30 = sshll.u32 %s3031_s11, 4  ;;  %s1058_s30 = int_to_ptr.hbm [resolvable:$true] %s1057_s30 }
 0x331   : > { %1352 = vmatpush.bf16.msra.mxu1 %v2080_v57  ;;  %v2076_v34 = vor.u32 %v2274_v59, %v2073_v32  ;;  %1064 = dma.hbm_to_vmem [thread:$0]  %s1058_s30, 1024, %s484_s24, [#allocation3 + $0x1], %s2700_s14, %s2701_s17, %s2702_s19 }
 0x332   : > { %2135 = vmatmul.msk.bf16.vlgmr.msrb.gmra.mxu3 %vm2908_vm6, %v2134_v44  ;;  %v1074_v31 = vld [vmem:[%s3027_s7] sm:$0x3] }
 0x333   : > { %1372 = vmatpush.bf16.msra.mxu3 %v2068_v37  ;;  %1341 = vmatmul.bf16.vlgmr.msra.gmra.mxu0 %v2941_v48  ;;  %v1077_v43 = vperm.slane %v1074_v31, 1  ;;  %v1076_v54 = vperm.slane %v1074_v31, 0 }
 0x334   : > { %1385 = vmatpush.bf16.msrb.mxu0 %v2132_v38  ;;  %1366 = vmatpush.bf16.msra.mxu2 %v1948_v61 }
 0x335   : > { %1353 = vmatpush.bf16.msra.mxu1 %v2072_v10 }
 0x337   : > { %1373 = vmatpush.bf16.msra.mxu3 %v2060_v51  ;;  %2141 = vmatmul.msk.bf16.vlgmr.msra.gmra.mxu2 %vm2908_vm6, %v2134_v44 }
 0x338   : > { %1386 = vmatpush.bf16.msrb.mxu0 %v2124_v52  ;;  %2138 = vmatmul.msk.bf16.vlgmr.msra.gmra.mxu1 %vm2912_vm7, %v2137_v15 }
 0x33b   : > { %1374 = vmatpush.bf16.msra.mxu3 %v2052_v0 }
 0x33c   : > { %1387 = vmatpush.bf16.msrb.mxu0 %v2116_v3 }
 0x33f   : > { %1375 = vmatpush.bf16.msra.mxu3 %v2044_v11 }
 0x340   : > { %1388 = vmatpush.bf16.msrb.mxu0 %v2108_v12 }
 0x343   : > { %1376 = vmatpush.bf16.msra.mxu3 %v2036_v17 }
 0x344   : > { %1389 = vmatpush.bf16.msrb.mxu0 %v2100_v16 }
 0x347   : > { %1377 = vmatpush.bf16.msra.mxu3 %v2028_v22 }
 0x348   : > { %1390 = vmatpush.bf16.msrb.mxu0 %v2092_v30 }
 0x34b   : > { %1378 = vmatpush.bf16.msra.mxu3 %v2020_v29 }
 0x34c   : > { %1391 = vmatpush.bf16.msrb.mxu0 %v2084_v55 }
 0x34f   : > { %1379 = vmatpush.bf16.msra.mxu3 %v2012_v33 }
 0x350   : > { %1392 = vmatpush.bf16.msrb.mxu0 %v2076_v34 }
 0x352   : > { %1380 = vmatmul.bf16.vlgmr.msra.gmra.mxu3 %v2941_v48 }
 0x353   : > { %2144 = vmatmul.msk.bf16.vlgmr.msrb.gmra.mxu0 %vm2912_vm7, %v2137_v15 }
 0x3b0   : > { %v1342_v35 = vpop.f32.mrf.mxu0 }
 0x3b5   : > { %v1329_v36 = vpop.f32.mrf.mxu3  ;;  %v1355_v38 = vpop.f32.mrf.mxu1 }
 0x3b6   : > { %v1330_v58 = vadd.f32 %v1329_v36, %v1076_v54 }
 0x3b8   : > { %v1344_v37 = vpop.f32.mrf.mxu0  ;;  %v1343_v63 = vadd.f32 %v1342_v35, %v1330_v58 }
 0x3ba   : > { %v1368_v39 = vpop.f32.mrf.mxu2  ;;  %v1356_v7 = vadd.f32 %v1355_v38, %v1343_v63 }
 0x3bb   : > { %v1369_v45 = vadd.f32 %v1368_v39, %v1077_v43 }
 0x3bd   : > { %v1331_v40 = vpop.f32.mrf.mxu3  ;;  %v1357_v41 = vpop.f32.mrf.mxu1 }
 0x3c2   : > { %v1370_v42 = vpop.f32.mrf.mxu2 }
 0x3d0   : > { %v1394_v44 = vpop.f32.mrf.mxu0 }
 0x3d5   : > { %v1381_v46 = vpop.f32.mrf.mxu3 }
 0x3d6   : > { %v1382_v47 = vadd.f32 %v1381_v46, %v1369_v45 }
 0x3d8   : > { %v1395_v48 = vadd.f32 %v1394_v44, %v1382_v47  ;;  %v1396_v49 = vpop.f32.mrf.mxu0 }
 0x3da   : > { %v2145_v50 = vmul.f32 -1.442695, %v1395_v48 }
 0x3dc   : > { %2392 = vpow2.f32 %v2145_v50 }
 0x3dd   : > { %v1383_v51 = vpop.f32.mrf.mxu3 }
 0x3e2   : > { %v2393_v52 = vpop.eup %2392 }
 0x3e3   : > { %v1401_v53 = vadd.f32 1.0, %v2393_v52 }
 0x3e5   : > { %2394 = vrcp.f32 %v1401_v53  ;;  %v1413_v62 = vand.u32 2147483648, %v1401_v53  ;;  %v1411_v3 = vand.u32 2147483647, %v1401_v53  ;;  %vm1407_vm13 = vweird.f32 %v1401_v53 }
 0x3e7   : > { %v1414_v5 = vor.u32 1.1754944e-38, %v1413_v62  ;;  %vm1412_vm15 = vcmp.eq.f32.partialorder %v1411_v3, 8.507059e+37 }
 0x3eb   : > { %v2395_v57 = vpop.eup %2394 }
 0x3ec   : > { %v1403_v60 = vmul.f32 %v2395_v57, %v1401_v53  ;;  %vm1408_vm12 = vweird.f32 %v2395_v57 }
 0x3ed   : > { %vm1409_vm14 = vmor %vm1407_vm13, %vm1408_vm12 }
 0x3ee   : > { %v1404_v61 = vsub.f32 1.0, %v1403_v60 }
 0x3f0   : > { %v1405_v0 = vmul.f32 %v2395_v57, %v1404_v61 }
 0x3f2   : > { %v1406_v4 = vadd.f32 %v2395_v57, %v1405_v0 }
 0x3f4   : > { %v1410_v8 = vsel %vm1409_vm14, %v2395_v57, %v1406_v4 }
 0x3f5   : > { %v1415_v9 = vsel %vm1412_vm15, %v1414_v5, %v1410_v8 }
 0x3f6   : > { %v1417_v10 = vmul.f32 %v1415_v9, %v1356_v7 }
 0x3f7   : > { %2669 = dma.done.wait [#allocation3 + $0x1], 1024 }
 0x3f8   : > { %2670 = vsyncadd [#allocation3 + $0x1], 4294966272  ;;  %v2176_v11 = vld [vmem:[#allocation2 + $0x1f0] sm:$0xf]  ;;  %v2297_v12 = vld [vmem:[#allocation2 + $0x1f4] sm:$0xf0]  ;;  %v1436_v32 = vpack.c.bf16 %v1417_v10, %v1417_v10 }
 0x3f9   : > { %v2172_v13 = vld [vmem:[#allocation2 + $0x1e0] sm:$0xf]  ;;  %v2177_v14 = vor.u32 %v2297_v12, %v2176_v11  ;;  %v2296_v15 = vld [vmem:[#allocation2 + $0x1e4] sm:$0xf0]  ;;  %v2168_v2 = vld [vmem:[#allocation2 + $0x1d0] sm:$0xf] }
 0x3fa   : > { %v2173_v1 = vor.u32 %v2296_v15, %v2172_v13  ;;  %v2295_v17 = vld [vmem:[#allocation2 + $0x1d4] sm:$0xf0]  ;;  %v2164_v18 = vld [vmem:[#allocation2 + $0x1c0] sm:$0xf]  ;;  %v2294_v19 = vld [vmem:[#allocation2 + $0x1c4] sm:$0xf0] }
 0x3fb   : > { %1489 = vmatpush.bf16.msrb.mxu1 %v2177_v14  ;;  %v2169_v16 = vor.u32 %v2295_v17, %v2168_v2  ;;  %v2165_v20 = vor.u32 %v2294_v19, %v2164_v18  ;;  %v2160_v21 = vld [vmem:[#allocation2 + $0x1b0] sm:$0xf]  ;;  %v2293_v22 = vld [vmem:[#allocation2 + $0x1b4] sm:$0xf0]  ;;  %v2156_v23 = vld [vmem:[#allocation2 + $0x1a0] sm:$0xf] }
 0x3fc   : > { %v2161_v30 = vor.u32 %v2293_v22, %v2160_v21  ;;  %v2292_v25 = vld [vmem:[#allocation2 + $0x1a4] sm:$0xf0]  ;;  %v2152_v27 = vld [vmem:[#allocation2 + $0x190] sm:$0xf]  ;;  %v2291_v29 = vld [vmem:[#allocation2 + $0x194] sm:$0xf0] }
 0x3fd   : > { %v2157_v26 = vor.u32 %v2292_v25, %v2156_v23  ;;  %v2153_v55 = vor.u32 %v2291_v29, %v2152_v27  ;;  %v2148_v56 = vld [vmem:[#allocation2 + $0x180] sm:$0xf]  ;;  %v2290_v6 = vld [vmem:[#allocation2 + $0x184] sm:$0xf0]  ;;  %s2180_s14 = sshll.u32 %s2796_s29, 3  ;;  %s1525_s3 = sshll.u32 %s2879_s20, 4  ;;  %s1526_s3 = int_to_ptr.vmem [resolvable:$true] %s1525_s3 }
 0x3fe   : > { %v2149_v59 = vor.u32 %v2290_v6, %v2148_v56  ;;  %v2396_v33 = vld [vmem:[%s3025_s5] ss:$0 sm:$0xff]  ;;  %s1523_s27 = scalar_lea.hbm %s3032_s12, %s2180_s14  ;;  %s1537_s0 = scalar_lea.hbm %s3033_s13, %s2180_s14 }
 0x3ff   : > { %1490 = vmatpush.bf16.msrb.mxu1 %v2173_v1  ;;  %s1527_s30 = sshll.u32 %s1523_s27, 4  ;;  %s1539_s29 = sshll.u32 %s2881_s23, 4  ;;  %s1528_s30 = int_to_ptr.hbm [resolvable:$true] %s1527_s30  ;;  %s1540_s29 = int_to_ptr.vmem [resolvable:$true] %s1539_s29 }
 0x400   : > { %s1541_s17 = sshll.u32 %s1537_s0, 4  ;;  %s1508_s19 = scalar_lea.sflag [#allocation6], %s2863_s15  ;;  %s1542_s17 = int_to_ptr.hbm [resolvable:$true] %s1541_s17 }
 0x401   : > { %s2597_s24 = sshra.s32 %s1528_s30, 4  ;;  %s2603_s14 = scalar_lea.hbm %s3032_s12, 16  ;;  %s2598_s24 = int_to_ptr.hbm [resolvable:$true] %s2597_s24 }
 0x402   : > { %s2599_s22 = scalar_lea.hbm %s2598_s24, 8  ;;  %p2604_p3 = scmp.lt.s32.totalorder %s2598_s24, %s3032_s12 }
 0x403   : > { %1491 = vmatpush.bf16.msrb.mxu1 %v2169_v16  ;;  %p2600_p0 = scmp.ne.s32.totalorder %s2598_s24, %s2599_s22  ;;  %p2605_p4 = scmp.lt.s32.totalorder %s2603_s14, %s2599_s22 }
 0x405   : > { %p2601_p1 = pnand %p2600_p0, %p2813_p5  ;;  %p2606_p7 = por %p2605_p4, %p2604_p3 }
 0x407   : > { %1492 = vmatpush.bf16.msrb.mxu1 %v2165_v20  ;;  %p2602_p2 = pneg %p2601_p1 }
 0x409   : > { %p2607_p8 = pnand %p2606_p7, %p2602_p2 }
 0x40b   : > { %1493 = vmatpush.bf16.msrb.mxu1 %v2161_v30 }
 0x40f   : > { %1494 = vmatpush.bf16.msrb.mxu1 %v2157_v26 }
 0x413   : > { %1495 = vmatpush.bf16.msrb.mxu1 %v2153_v55 }
 0x417   : > { %1496 = vmatpush.bf16.msrb.mxu1 %v2149_v59 }
 0x41a   : > { %1497 = vmatmul.bf16.vlgmr.msrb.gmra.mxu1 %v1436_v32 }
 0x497   : > { %v1498_v34 = vpop.f32.mrf.mxu1 }
 0x498   : > { %v1499_v35 = vadd.f32 %v2396_v33, %v1498_v34 }
 0x49a   : > { %v1502_v36 = vmul.f32 %v1499_v35, %v2904_v24 }
 0x49c   : > { %1503 = vst [vmem:[%s2879_s20] sm:$0xff] %v1502_v36  ;;  %v1504_v37 = vadd.f32 %v1502_v36, %v2877_v28 }
 0x49d   : > { %2610 = shalt.err (!%p2607_p8)
}
 0x49e   : > { %2310 = dma.vmem_to_hbm [thread:$0]  (%p2813_p5), %s1526_s3, 128, %s1528_s30, %s1508_s19   ;;  %v1505_v28 = vmul.f32 0.70710677, %v1504_v37 }
 0x49f   : > { %v1500_v24 = vpop.f32.mrf.mxu1  ;;  %s1513_s0 = scalar_lea.sflag [#allocation12], %s2863_s15  ;;  %s2625_s20 = sshra.s32 %s1542_s17, 4  ;;  %s2626_s20 = int_to_ptr.hbm [resolvable:$true] %s2625_s20 }
 0x4a0   : > { %1506 = vst [vmem:[%s2881_s23] sm:$0xff] %v1505_v28  ;;  %s2627_s1 = scalar_lea.hbm %s2626_s20, 8  ;;  %s2631_s27 = scalar_lea.hbm %s3033_s13, 16 }
 0x4a1   : > { %p2628_p9 = scmp.ne.s32.totalorder %s2626_s20, %s2627_s1  ;;  %p2632_p12 = scmp.lt.s32.totalorder %s2626_s20, %s3033_s13 }
 0x4a2   : > { %p2633_p13 = scmp.lt.s32.totalorder %s2631_s27, %s2627_s1 }
 0x4a3   : > { %p2629_p10 = pnand %p2628_p9, %p2813_p5 }
 0x4a4   : > { %p2634_p0 = por %p2633_p13, %p2632_p12 }
 0x4a5   : > { %p2630_p11 = pneg %p2629_p10 }
 0x4a7   : > { %p2635_p1 = pnand %p2634_p0, %p2630_p11 }
 0x4a9   : > { %2638 = shalt.err (!%p2635_p1)
}
 0x4aa   : > { %2311 = dma.vmem_to_hbm [thread:$0]  (%p2813_p5), %s1540_s29, 128, %s1542_s17, %s1513_s0  }
 0x4ab PF: > { %p2337_p2 = scmp.ge.s32.totalorder %s2693_s28, 2  ;;  %s1553_s23 = sand.u32 1, %s2681_s25  }
 0x4ac   : > { %s1554_s3 = scalar_lea.sflag [#allocation6], %s1553_s23 }
 0x4ad   : > { %p2325_p3 = pnand %p2337_p2, %p2817_p6 }
 0x4af   : > { %p2326_p4 = pneg %p2325_p3 }
 0x4b1   : > { %2672 = dma.done.wait (%p2326_p4), %s1554_s3, 128  }
 0x4b2   : > { %2674 = vsyncadd (%p2326_p4), %s1554_s3, 4294967168  ;;  %s1564_s30 = scalar_lea.sflag [#allocation12], %s1553_s23 }
 0x4b3   : > { %2676 = dma.done.wait (%p2326_p4), %s1564_s30, 128  }
 0x4b4   : > { %2678 = vsyncadd (%p2326_p4), %s1564_s30, 4294967168  ;;  %s3056_s28 = sld [smem:[#allocation30_spill]]  ;;  %s3059_s25 = smov %s2685_s26 }
 0x4b5   : > { %s3057_s19 = sld [smem:[#allocation29_spill]] }
 0x4b6   : > { %s3058_s27 = sld [smem:[#allocation31_spill]] }
 0x4ba   : > { %p29_p5 = scmp.ge.s32.totalorder %s3056_s28, 4  }
 0x4bb   : > { %s3060_s26 = smov %s3057_s19 }
 0x4bc   :  { %31 = sbr.rel (!%p29_p5) target bundleno = 11 (0xb), region = 131 }
 0x4c1   :  { %1570 = vsyncpa [#allocation5], 1 }
 0x4c2   :  { %1572 = vsyncpa [#allocation5 + $0x1], 1 }
 0x4c3   :  { %1573 = vsyncpa [#allocation8], 1 }
 0x4c4   :  { %1574 = vsyncpa [#allocation6], 1 }
 0x4c5   :  { %1576 = vsyncpa [#allocation6 + $0x1], 1 }
 0x4c6   :  { %1577 = vsyncpa [#allocation12], 1 }
 0x4c7   :  { %1579 = vsyncpa [#allocation12 + $0x1], 1 }
 0x4c8   :  { %1580 = vsyncmov [#allocation3] }
 0x4cb   :  { %s1581_s18 = vpop.sfrf %1580 }
 0x4cc   :  { %p2184_p6 = scmp.ne.s32.totalorder %s1581_s18, 0 }
 0x4ce   :  { %1585 = shalt.err (%p2184_p6)  }
 0x4cf   :  { %1587 = vsyncmov [#allocation3 + $0x1] }
 0x4d2   :  { %s1588_s29 = vpop.sfrf %1587 }
 0x4d3   :  { %p2185_p7 = scmp.ne.s32.totalorder %s1588_s29, 0 }
 0x4d5   :  { %1592 = shalt.err (%p2185_p7)  }

</bundles_post_ra>
